<compile_context>
chip_gen: v6e
topology: v6e:2x2x1
jax: 0.10.0
libtpu: 0.0.40
codegen_flags: <defaults>
</compile_context>

<pallas_src>
import math
import functools

import jax
import jax.numpy as jnp
from jax.experimental import pallas as pl
from jax.experimental.pallas import tpu as pltpu


_HALF_LOG_2PI = 0.5 * math.log(2.0 * math.pi)
_LOG_2 = math.log(2.0)


def _policy_kernel(xin_ref, w1_ref, b1_ref, w2_ref, b2_ref, wh_ref, bh_ref, out_ref,
                   *, din_p, dp, out_dim, training):
    """Feature-major MLP policy step.

    xin_ref : (din_p [+ dp], TILE_B) -- x^T, with eps^T packed below it when training.
    w*_ref  : transposed weights (out_features, in_features); b*_ref: (out_features, 1).
    out_ref : (dp + 1, TILE_B)       -- rows [0, dp) = tanh(a), row dp = logp.
    """
    x = xin_ref[:din_p, :]                                       # (din_p, tb)

    h1 = jnp.dot(w1_ref[...], x, preferred_element_type=jnp.float32,
                 precision=jax.lax.Precision.HIGHEST) + b1_ref[...]
    h1 = jnp.maximum(h1, 0.0)
    h2 = jnp.dot(w2_ref[...], h1, preferred_element_type=jnp.float32,
                 precision=jax.lax.Precision.HIGHEST) + b2_ref[...]
    h2 = jnp.maximum(h2, 0.0)

    # Fused heads: rows [0, dp) = mu, rows [dp, 2*dp) = log_std. dp is sublane-aligned,
    # so both slices fall on (8,128) tile boundaries.
    y = jnp.dot(wh_ref[...], h2, preferred_element_type=jnp.float32,
                precision=jax.lax.Precision.HIGHEST) + bh_ref[...]
    mu = y[:dp, :]
    log_std = jnp.clip(y[dp:, :], -3.0, 1.0)

    if training:
        eps = xin_ref[din_p:, :]                                 # (dp, tb)
        a = mu + jnp.exp(log_std) * eps
        # a - mu == std * eps  =>  -(a-mu)^2 / (2 std^2) == -0.5 * eps^2
        lp = -0.5 * eps * eps - log_std - _HALF_LOG_2PI
    else:
        a = mu
        lp = -log_std - _HALF_LOG_2PI                            # quadratic term == 0

    # tanh-squash correction: 2*(log2 - a - softplus(-2a)).
    corr = 2.0 * (_LOG_2 - a - jnp.logaddexp(0.0, -2.0 * a))
    contrib = lp - corr
    if dp != out_dim:                                            # mask padded action rows
        row = jax.lax.broadcasted_iota(jnp.int32, contrib.shape, 0)
        contrib = jnp.where(row < out_dim, contrib, 0.0)
    logp = jnp.sum(contrib, axis=0, keepdims=True)               # (1, tb)

    out_ref[...] = jnp.concatenate([jnp.tanh(a), logp], axis=0)  # single lane-dense store


def _round_up(n, m):
    return ((n + m - 1) // m) * m


def policy_forward(x, params, eps=None, *, training=False, tile_b=4096):
    """Policy forward pass as a single Pallas call.

    x      : (B, input_dim) float32
    params : dict with w1,b1,w2,b2,wmu,bmu,wls,bls (weights stored (in, out), biases (1, out))
    eps    : (B, out_dim) float32 standard-normal noise (required iff training=True)
    Returns (action (B, out_dim), logp_pi (B,)).
    """
    x = jnp.asarray(x, jnp.float32)
    B, input_dim = x.shape
    hidden = params["w1"].shape[1]
    out_dim = params["wmu"].shape[1]
    if training and eps is None:
        raise ValueError("training=True requires reparameterization noise eps of "
                         "shape (B, out_dim)")

    dp = _round_up(out_dim, 8)        # sublane-aligned action dim (padded head rows are 0)
    din_p = _round_up(input_dim, 8)   # sublane-aligned input-feature dim

    # Transposed / padded resident weights for the feature-major kernel (W^T @ x^T).
    w1T = jnp.zeros((hidden, din_p), jnp.float32).at[:, :input_dim].set(params["w1"].T)
    b1T = jnp.reshape(params["b1"], (hidden, 1)).astype(jnp.float32)
    w2T = params["w2"].T.astype(jnp.float32)
    b2T = jnp.reshape(params["b2"], (hidden, 1)).astype(jnp.float32)
    whT = (jnp.zeros((2 * dp, hidden), jnp.float32)
           .at[:out_dim, :].set(params["wmu"].T)
           .at[dp:dp + out_dim, :].set(params["wls"].T))
    bhT = (jnp.zeros((2 * dp, 1), jnp.float32)
           .at[:out_dim, 0].set(jnp.reshape(params["bmu"], (-1,)))
           .at[dp:dp + out_dim, 0].set(jnp.reshape(params["bls"], (-1,))))

    # Batch is the lane axis: tiles are multiples of 128 lanes, as large as requested, but
    # keep >=2 grid steps when the batch spans >=2 lane tiles so v7x's two TCs both work.
    lane = 128
    b_lanes = _round_up(B, lane)
    tb = min(_round_up(tile_b, lane), b_lanes)
    if b_lanes >= 2 * lane and b_lanes <= tb:
        tb = _round_up((b_lanes + 1) // 2, lane)
    Bp = _round_up(b_lanes, tb)
    num_steps = Bp // tb

    # Pack x^T (and eps^T when training) into one streamed input; padded rows/cols are 0
    # and flow through relu/exp/tanh/logaddexp as finite values, sliced off below.
    xin = jnp.zeros((din_p + (dp if training else 0), Bp), jnp.float32)
    xin = xin.at[:input_dim, :B].set(x.T)
    if training:
        xin = xin.at[din_p:din_p + out_dim, :B].set(jnp.asarray(eps, jnp.float32).T)
    in_rows = xin.shape[0]
    out_rows = dp + 1

    def full_spec(arr):
        return pl.BlockSpec(arr.shape, lambda i: (0,) * arr.ndim)

    out = pl.pallas_call(
        functools.partial(_policy_kernel, din_p=din_p, dp=dp, out_dim=out_dim,
                          training=training),
        out_shape=jax.ShapeDtypeStruct((out_rows, Bp), jnp.float32),
        grid=(num_steps,),
        in_specs=[pl.BlockSpec((in_rows, tb), lambda i: (0, i)),
                  full_spec(w1T), full_spec(b1T),
                  full_spec(w2T), full_spec(b2T),
                  full_spec(whT), full_spec(bhT)],
        out_specs=pl.BlockSpec((out_rows, tb), lambda i: (0, i)),
        compiler_params=pltpu.CompilerParams(dimension_semantics=("parallel",)),
    )(xin, w1T, b1T, w2T, b2T, whT, bhT)

    return out[:out_dim, :B].T, out[dp, :B]


def init_params(key, input_dim, out_dim, hidden_dim=64):
    """Parameter init mimicking nn.Linear defaults (uniform(+/-1/sqrt(fan_in)));
    mu head weights use uniform(-3e-3, 3e-3) as in the PyTorch module."""
    ks = jax.random.split(key, 8)

    def linear(kw, kb, fan_in, fan_out, bound=None):
        wb = bound if bound is not None else 1.0 / math.sqrt(fan_in)
        w = jax.random.uniform(kw, (fan_in, fan_out), jnp.float32, -wb, wb)
        bias = jax.random.uniform(kb, (1, fan_out), jnp.float32,
                                  -1.0 / math.sqrt(fan_in), 1.0 / math.sqrt(fan_in))
        return w, bias

    w1, b1 = linear(ks[0], ks[1], input_dim, hidden_dim)
    w2, b2 = linear(ks[2], ks[3], hidden_dim, hidden_dim)
    wmu, bmu = linear(ks[4], ks[5], hidden_dim, out_dim, bound=0.003)
    wls, bls = linear(ks[6], ks[7], hidden_dim, out_dim)
    return dict(w1=w1, b1=b1, w2=w2, b2=b2, wmu=wmu, bmu=bmu, wls=wls, bls=bls)


def _mm(a, b):
    return jnp.dot(a, b, precision=jax.lax.Precision.HIGHEST)


def _reference(x, p, eps, training):
    h1 = jax.nn.relu(_mm(x, p["w1"]) + p["b1"])
    h2 = jax.nn.relu(_mm(h1, p["w2"]) + p["b2"])
    mu = _mm(h2, p["wmu"]) + p["bmu"]
    log_std = jnp.clip(_mm(h2, p["wls"]) + p["bls"], -3.0, 1.0)
    std = jnp.exp(log_std)
    a = mu + std * eps if training else mu
    lp = (-((a - mu) ** 2) / (2.0 * std ** 2) - log_std
          - 0.5 * math.log(2.0 * math.pi)).sum(-1)
    lp -= (2.0 * (math.log(2.0) - a - jax.nn.softplus(-2.0 * a))).sum(-1)
    return jnp.tanh(a), lp


if __name__ == "__main__":
    key = jax.random.PRNGKey(0)
    keys = jax.random.split(key, 8)

    # Case 1: aligned dims (out_dim multiple of 8), single-tile grid, eval + training.
    B, input_dim, hidden_dim, out_dim = 8, 32, 64, 8
    params = init_params(keys[0], input_dim, out_dim, hidden_dim)
    x = jax.random.normal(keys[1], (B, input_dim), jnp.float32)
    eps = jax.random.normal(keys[2], (B, out_dim), jnp.float32)

    act, logp = policy_forward(x, params, training=False)
    act_t, logp_t = policy_forward(x, params, eps, training=True)
    jax.block_until_ready((act, logp, act_t, logp_t))

    ref_act, ref_logp = _reference(x, params, eps, False)
    ref_act_t, ref_logp_t = _reference(x, params, eps, True)
    assert act.shape == (B, out_dim) and logp.shape == (B,)
    assert jnp.allclose(act, ref_act, atol=1e-5)
    assert jnp.allclose(logp, ref_logp, atol=1e-4)
    assert jnp.allclose(act_t, ref_act_t, atol=1e-5)
    assert jnp.allclose(logp_t, ref_logp_t, atol=1e-4)

    # Case 2: multi-step grid + batch padding (B not a multiple of the lane tile).
    B2 = 300
    x2 = jax.random.normal(keys[3], (B2, input_dim), jnp.float32)
    eps2 = jax.random.normal(keys[4], (B2, out_dim), jnp.float32)
    act2, logp2 = policy_forward(x2, params, eps2, training=True, tile_b=128)
    jax.block_until_ready((act2, logp2))
    ref_act2, ref_logp2 = _reference(x2, params, eps2, True)
    assert act2.shape == (B2, out_dim) and logp2.shape == (B2,)
    assert jnp.allclose(act2, ref_act2, atol=1e-5)
    assert jnp.allclose(logp2, ref_logp2, atol=1e-4)

    # Case 3: unaligned feature dims (exercises head/input padding + logp row mask).
    B3, in3, out3 = 16, 20, 5
    params3 = init_params(keys[5], in3, out3, hidden_dim)
    x3 = jax.random.normal(keys[6], (B3, in3), jnp.float32)
    eps3 = jax.random.normal(keys[7], (B3, out3), jnp.float32)
    act3, logp3 = policy_forward(x3, params3, eps3, training=True)
    act3e, logp3e = policy_forward(x3, params3, training=False)
    jax.block_until_ready((act3, logp3, act3e, logp3e))
    ref_act3, ref_logp3 = _reference(x3, params3, eps3, True)
    ref_act3e, ref_logp3e = _reference(x3, params3, eps3, False)
    assert act3.shape == (B3, out3) and logp3.shape == (B3,)
    assert jnp.allclose(act3, ref_act3, atol=1e-5)
    assert jnp.allclose(logp3, ref_logp3, atol=1e-4)
    assert jnp.allclose(act3e, ref_act3e, atol=1e-5)
    assert jnp.allclose(logp3e, ref_logp3e, atol=1e-4)

    print("KERNEL_OK")
</pallas_src>

<mosaic_0001>
module attributes {stable_mosaic.version = 11 : i64} {
  func.func @_policy_kernel(%arg0: i32, %arg1: memref<32x128xf32, #tpu.memory_space<vmem>>, %arg2: memref<64x32xf32, #tpu.memory_space<vmem>>, %arg3: memref<64x1xf32, #tpu.memory_space<vmem>>, %arg4: memref<64x64xf32, #tpu.memory_space<vmem>>, %arg5: memref<64x1xf32, #tpu.memory_space<vmem>>, %arg6: memref<16x64xf32, #tpu.memory_space<vmem>>, %arg7: memref<16x1xf32, #tpu.memory_space<vmem>>, %arg8: memref<9x128xf32, #tpu.memory_space<vmem>>) attributes {dimension_semantics = [#tpu.dimension_semantics<parallel>], iteration_bounds = array<i64: 1>, scalar_prefetch = 0 : i64, scratch_operands = 0 : i64, tpu.core_type = #tpu.core_type<tc>, window_params = [{transform_indices = @transform_0, window_bounds = array<i64: 32, 128>}, {pipeline_mode = #tpu.pipeline_mode<synchronous>, transform_indices = @transform_1, window_bounds = array<i64: 64, 32>}, {pipeline_mode = #tpu.pipeline_mode<synchronous>, transform_indices = @transform_2, window_bounds = array<i64: 64, 1>}, {pipeline_mode = #tpu.pipeline_mode<synchronous>, transform_indices = @transform_3, window_bounds = array<i64: 64, 64>}, {pipeline_mode = #tpu.pipeline_mode<synchronous>, transform_indices = @transform_4, window_bounds = array<i64: 64, 1>}, {pipeline_mode = #tpu.pipeline_mode<synchronous>, transform_indices = @transform_5, window_bounds = array<i64: 16, 64>}, {pipeline_mode = #tpu.pipeline_mode<synchronous>, transform_indices = @transform_6, window_bounds = array<i64: 16, 1>}, {transform_indices = @transform_7, window_bounds = array<i64: 9, 128>}]} {
    %c0 = arith.constant 0 : index
    %c0_0 = arith.constant 0 : index
    %0 = vector.load %arg1[%c0, %c0_0] : memref<32x128xf32, #tpu.memory_space<vmem>>, vector<32x128xf32>
    %c0_1 = arith.constant 0 : index
    %c0_2 = arith.constant 0 : index
    %1 = vector.load %arg2[%c0_1, %c0_2] : memref<64x32xf32, #tpu.memory_space<vmem>>, vector<64x32xf32>
    %cst = arith.constant dense<0.000000e+00> : vector<64x128xf32>
    %2 = tpu.matmul %1, %0, %cst {dimension_numbers = #tpu.dot_dimension_numbers<[1], [0], [0], [1], [0, 0, 1, 1], [], []>, precision = #tpu.contract_precision<fp32>} : vector<64x32xf32>, vector<32x128xf32>, vector<64x128xf32> -> vector<64x128xf32>
    %c0_3 = arith.constant 0 : index
    %c0_4 = arith.constant 0 : index
    %3 = vector.load %arg3[%c0_3, %c0_4] : memref<64x1xf32, #tpu.memory_space<vmem>>, vector<64x1xf32>
    %4 = vector.broadcast %3 : vector<64x1xf32> to vector<64x128xf32>
    %5 = arith.addf %2, %4 : vector<64x128xf32>
    %cst_5 = arith.constant 0.000000e+00 : f32
    %6 = vector.broadcast %cst_5 : f32 to vector<64x128xf32>
    %7 = arith.maximumf %5, %6 : vector<64x128xf32>
    %c0_6 = arith.constant 0 : index
    %c0_7 = arith.constant 0 : index
    %8 = vector.load %arg4[%c0_6, %c0_7] : memref<64x64xf32, #tpu.memory_space<vmem>>, vector<64x64xf32>
    %cst_8 = arith.constant dense<0.000000e+00> : vector<64x128xf32>
    %9 = tpu.matmul %8, %7, %cst_8 {dimension_numbers = #tpu.dot_dimension_numbers<[1], [0], [0], [1], [0, 0, 1, 1], [], []>, precision = #tpu.contract_precision<fp32>} : vector<64x64xf32>, vector<64x128xf32>, vector<64x128xf32> -> vector<64x128xf32>
    %c0_9 = arith.constant 0 : index
    %c0_10 = arith.constant 0 : index
    %10 = vector.load %arg5[%c0_9, %c0_10] : memref<64x1xf32, #tpu.memory_space<vmem>>, vector<64x1xf32>
    %11 = vector.broadcast %10 : vector<64x1xf32> to vector<64x128xf32>
    %12 = arith.addf %9, %11 : vector<64x128xf32>
    %cst_11 = arith.constant 0.000000e+00 : f32
    %13 = vector.broadcast %cst_11 : f32 to vector<64x128xf32>
    %14 = arith.maximumf %12, %13 : vector<64x128xf32>
    %c0_12 = arith.constant 0 : index
    %c0_13 = arith.constant 0 : index
    %15 = vector.load %arg6[%c0_12, %c0_13] : memref<16x64xf32, #tpu.memory_space<vmem>>, vector<16x64xf32>
    %cst_14 = arith.constant dense<0.000000e+00> : vector<16x128xf32>
    %16 = tpu.matmul %15, %14, %cst_14 {dimension_numbers = #tpu.dot_dimension_numbers<[1], [0], [0], [1], [0, 0, 1, 1], [], []>, precision = #tpu.contract_precision<fp32>} : vector<16x64xf32>, vector<64x128xf32>, vector<16x128xf32> -> vector<16x128xf32>
    %c0_15 = arith.constant 0 : index
    %c0_16 = arith.constant 0 : index
    %17 = vector.load %arg7[%c0_15, %c0_16] : memref<16x1xf32, #tpu.memory_space<vmem>>, vector<16x1xf32>
    %18 = vector.broadcast %17 : vector<16x1xf32> to vector<16x128xf32>
    %19 = arith.addf %16, %18 : vector<16x128xf32>
    %20 = vector.extract_strided_slice %19 {offsets = [0, 0], sizes = [8, 128], strides = [1, 1]} : vector<16x128xf32> to vector<8x128xf32>
    %21 = vector.extract_strided_slice %19 {offsets = [8, 0], sizes = [8, 128], strides = [1, 1]} : vector<16x128xf32> to vector<8x128xf32>
    %cst_17 = arith.constant -3.000000e+00 : f32
    %cst_18 = arith.constant 1.000000e+00 : f32
    %22 = vector.broadcast %cst_17 : f32 to vector<8x128xf32>
    %23 = arith.maximumf %22, %21 : vector<8x128xf32>
    %24 = vector.broadcast %cst_18 : f32 to vector<8x128xf32>
    %25 = arith.minimumf %24, %23 : vector<8x128xf32>
    %cst_19 = arith.constant 0.000000e+00 : f32
    %26 = vector.broadcast %cst_19 : f32 to vector<8x128xf32>
    %27 = arith.subf %26, %25 : vector<8x128xf32>
    %cst_20 = arith.constant 0.918938517 : f32
    %28 = vector.broadcast %cst_20 : f32 to vector<8x128xf32>
    %29 = arith.subf %27, %28 : vector<8x128xf32>
    %cst_21 = arith.constant 0.693147182 : f32
    %30 = vector.broadcast %cst_21 : f32 to vector<8x128xf32>
    %31 = arith.subf %30, %20 : vector<8x128xf32>
    %cst_22 = arith.constant -2.000000e+00 : f32
    %32 = vector.broadcast %cst_22 : f32 to vector<8x128xf32>
    %33 = arith.mulf %32, %20 : vector<8x128xf32>
    %cst_23 = arith.constant 0.000000e+00 : f32
    %34 = vector.broadcast %cst_23 : f32 to vector<8x128xf32>
    %35 = arith.maximumf %34, %33 : vector<8x128xf32>
    %36 = vector.broadcast %cst_23 : f32 to vector<8x128xf32>
    %37 = arith.subf %36, %33 : vector<8x128xf32>
    %38 = arith.cmpf one, %37, %37 : vector<8x128xf32>
    %39 = vector.broadcast %cst_23 : f32 to vector<8x128xf32>
    %40 = arith.addf %39, %33 : vector<8x128xf32>
    %41 = math.absf %37 : vector<8x128xf32>
    %cst_24 = arith.constant 0.000000e+00 : f32
    %42 = vector.broadcast %cst_24 : f32 to vector<8x128xf32>
    %43 = arith.subf %42, %41 : vector<8x128xf32>
    %44 = math.exp %43 : vector<8x128xf32>
    %45 = math.log1p %44 : vector<8x128xf32>
    %46 = arith.addf %35, %45 : vector<8x128xf32>
    %47 = arith.select %38, %40, %46 : vector<8x128xi1>, vector<8x128xf32>
    %48 = arith.subf %31, %47 : vector<8x128xf32>
    %cst_25 = arith.constant 2.000000e+00 : f32
    %49 = vector.broadcast %cst_25 : f32 to vector<8x128xf32>
    %50 = arith.mulf %49, %48 : vector<8x128xf32>
    %51 = arith.subf %29, %50 : vector<8x128xf32>
    %cst_26 = arith.constant dense<0.000000e+00> : vector<128xf32>
    %52 = vector.multi_reduction <add>, %51, %cst_26 [0] : vector<8x128xf32> to vector<128xf32>
    %53 = vector.shape_cast %52 : vector<128xf32> to vector<1x128xf32>
    %54 = math.tanh %20 : vector<8x128xf32>
    %55 = tpu.concatenate %54, %53 in 0 : vector<8x128xf32>, vector<1x128xf32> -> vector<9x128xf32>
    %c0_27 = arith.constant 0 : index
    %c0_28 = arith.constant 0 : index
    %56 = vector.load %arg8[%c0_27, %c0_28] : memref<9x128xf32, #tpu.memory_space<vmem>>, vector<9x128xf32>
    tpu.vector_store %arg8[%c0_27, %c0_28], %55 {strides = array<i32>} : memref<9x128xf32, #tpu.memory_space<vmem>>, vector<9x128xf32>,
    return
  }
  func.func @transform_0(%arg0: i32) -> (i32, i32) {
    %c0_i32 = arith.constant 0 : i32
    %c0_i32_0 = arith.constant 0 : i32
    return %c0_i32, %arg0 : i32, i32
  }
  func.func @transform_1(%arg0: i32) -> (i32, i32) {
    %c0_i32 = arith.constant 0 : i32
    %c0_i32_0 = arith.constant 0 : i32
    %c0_i32_1 = arith.constant 0 : i32
    return %c0_i32, %c0_i32_0 : i32, i32
  }
  func.func @transform_2(%arg0: i32) -> (i32, i32) {
    %c0_i32 = arith.constant 0 : i32
    %c0_i32_0 = arith.constant 0 : i32
    %c0_i32_1 = arith.constant 0 : i32
    return %c0_i32, %c0_i32_0 : i32, i32
  }
  func.func @transform_3(%arg0: i32) -> (i32, i32) {
    %c0_i32 = arith.constant 0 : i32
    %c0_i32_0 = arith.constant 0 : i32
    %c0_i32_1 = arith.constant 0 : i32
    return %c0_i32, %c0_i32_0 : i32, i32
  }
  func.func @transform_4(%arg0: i32) -> (i32, i32) {
    %c0_i32 = arith.constant 0 : i32
    %c0_i32_0 = arith.constant 0 : i32
    %c0_i32_1 = arith.constant 0 : i32
    return %c0_i32, %c0_i32_0 : i32, i32
  }
  func.func @transform_5(%arg0: i32) -> (i32, i32) {
    %c0_i32 = arith.constant 0 : i32
    %c0_i32_0 = arith.constant 0 : i32
    %c0_i32_1 = arith.constant 0 : i32
    return %c0_i32, %c0_i32_0 : i32, i32
  }
  func.func @transform_6(%arg0: i32) -> (i32, i32) {
    %c0_i32 = arith.constant 0 : i32
    %c0_i32_0 = arith.constant 0 : i32
    %c0_i32_1 = arith.constant 0 : i32
    return %c0_i32, %c0_i32_0 : i32, i32
  }
  func.func @transform_7(%arg0: i32) -> (i32, i32) {
    %c0_i32 = arith.constant 0 : i32
    %c0_i32_0 = arith.constant 0 : i32
    return %c0_i32, %arg0 : i32, i32
  }
}

</mosaic_0001>

<bundles_post_ra>
// kernel: tpu_custom_call.1
= control target key start
LH: loop header
LB: loop body
LE: loop exit
PB: predicated region body
PF: predicated region fallthrough
CT: control target
= control target key end

     0   :  { %vm87_vm0 = vcmask 261120   ;;  %v3151_v9 = vmov 0   ;;  %s4031_s0 = inlined_call_operand.vmem [shape: f32[32,128], index: 0, kind: input, shape index: {}]   ;;  %s4032_s1 = inlined_call_operand.vmem [shape: f32[64,32], index: 1, kind: input, shape index: {}]   ;;  %s4033_s2 = inlined_call_operand.vmem [shape: f32[64,1], index: 2, kind: input, shape index: {}]   ;;  %s4034_s3 = inlined_call_operand.vmem [shape: f32[64,64], index: 3, kind: input, shape index: {}]   ;;  %s4035_s4 = inlined_call_operand.vmem [shape: f32[64,1], index: 4, kind: input, shape index: {}]   ;;  %s4036_s5 = inlined_call_operand.vmem [shape: f32[16,64], index: 5, kind: input, shape index: {}]   ;;  %s4037_s6 = inlined_call_operand.vmem [shape: f32[16,1], index: 6, kind: input, shape index: {}]   ;;  %s4038_s7 = inlined_call_operand.hbm [shape: f32[9,128], index: 7, kind: output, shape index: {}]  }
   0x1   :  { %v30_v0 = vld [vmem:[%s4031_s0 + $0x18] sm:$0xff]  ;;  %v29_v1 = vld [vmem:[%s4031_s0 + $0x10] sm:$0xff]  ;;  %v28_v2 = vld [vmem:[%s4031_s0 + $0x8] sm:$0xff]  ;;  %3122 = vset.pattern.permute.xlu1 %v3151_v9  ;;  %3121 = vset.pattern.permute.xlu0 %v3151_v9 }
   0x2   :  { %v3204_v3 = vand.u32 4294901760, %v30_v0  ;;  %v3206_v4 = vand.u32 4294901760, %v29_v1  ;;  %v3208_v5 = vand.u32 4294901760, %v28_v2  ;;  %v27_v6 = vld [vmem:[%s4031_s0] sm:$0xff]  ;;  %v32_v8 = vld [vmem:[%s4032_s1 + $0x8] sm:$0xff]  ;;  %v33_v13 = vld [vmem:[%s4032_s1 + $0x10] sm:$0xff] }
   0x3   :  { %v31_v7 = vld [vmem:[%s4032_s1] sm:$0xff]  ;;  %v3219_v10 = vand.u32 4294901760, %v27_v6  ;;  %v92_v12 = vsel %vm87_vm0, %v32_v8, 0  ;;  %v34_v14 = vld [vmem:[%s4032_s1 + $0x18] sm:$0xff]  ;;  %v95_v20 = vsel %vm87_vm0, %v33_v13, 0  ;;  %v44_v24 = vld [vmem:[%s4033_s2 + $0x28] sm:$0xff] }
   0x4   :  { %v89_v11 = vsel %vm87_vm0, %v31_v7, 0  ;;  %2715 = vmatprep.subr.mxu0 %v3204_v3  ;;  %v3231_v15 = vsub.f32 %v30_v0, %v3204_v3  ;;  %v3235_v17 = vand.u32 4294901760, %v92_v12  ;;  %v3238_v18 = vsub.f32 %v29_v1, %v3206_v4  ;;  %v46_v23 = vld [vmem:[%s4033_s2 + $0x38] sm:$0xff]  ;;  %74 = vperm.xlu1 %3122, %v44_v24   ;;  %v45_v37 = vld [vmem:[%s4033_s2 + $0x30] sm:$0xff]  ;;  %v35_v42 = vld [vmem:[%s4032_s1 + $0x20] sm:$0xff] }
   0x5   :  { %v3233_v16 = vand.u32 4294901760, %v89_v11  ;;  %2716 = vmatpush3.msra.mxu0 %v3204_v3  ;;  %v3242_v19 = vsub.f32 %v28_v2, %v3208_v5  ;;  %v98_v21 = vsel %vm87_vm0, %v34_v14, 0  ;;  %v3247_v22 = vsub.f32 %v27_v6, %v3219_v10  ;;  %84 = vperm.xlu0 %3121, %v46_v23   ;;  %v36_v43 = vld [vmem:[%s4032_s1 + $0x28] sm:$0xff]  ;;  %v43_v48 = vld [vmem:[%s4033_s2 + $0x20] sm:$0xff]  ;;  %v37_v52 = vld [vmem:[%s4032_s1 + $0x30] sm:$0xff] }
   0x6   :  { %2717 = vmatprep.subr.mxu0 %v3206_v4  ;;  %v3257_v25 = vand.u32 4294901760, %v3231_v15  ;;  %v3263_v27 = vsub.f32 %v92_v12, %v3235_v17  ;;  %v3266_v28 = vand.u32 4294901760, %v3238_v18  ;;  %v3273_v30 = vand.u32 4294901760, %v95_v20  ;;  %v38_v53 = vld [vmem:[%s4032_s1 + $0x38] sm:$0xff] }
   0x7   :  { %v3260_v26 = vsub.f32 %v89_v11, %v3233_v16  ;;  %2743 = vmatprep.mubr.f32.mxu1 %v3233_v16  ;;  %2718 = vmatpush3.msra.mxu0 %v3206_v4  ;;  %v3271_v29 = vand.u32 4294901760, %v3242_v19  ;;  %v3275_v31 = vand.u32 4294901760, %v98_v21  ;;  %v3278_v32 = vand.u32 4294901760, %v3247_v22 }
   0x8   :  { %2719 = vmatprep.subr.mxu0 %v3208_v5  ;;  %v289_v33 = vsub.f32 %v3231_v15, %v3257_v25  ;;  %v193_v35 = vand.u32 4294901760, %v3263_v27  ;;  %v296_v36 = vsub.f32 %v3238_v18, %v3266_v28  ;;  %v3294_v39 = vsub.f32 %v95_v20, %v3273_v30 }
   0x9   :  { %v183_v34 = vand.u32 4294901760, %v3260_v26  ;;  %2720 = vmatpush3.msra.mxu0 %v3208_v5  ;;  %v303_v38 = vsub.f32 %v3242_v19, %v3271_v29  ;;  %v3297_v40 = vsub.f32 %v98_v21, %v3275_v31  ;;  %v310_v41 = vsub.f32 %v3247_v22, %v3278_v32  ;;  %79 = vperm.xlu0 %3121, %v45_v37  }
   0xa   :  { %2721 = vmatprep.subr.mxu0 %v3219_v10  ;;  %v290_v44 = vand.u32 4294901760, %v289_v33  ;;  %v194_v46 = vsub.f32 %v3263_v27, %v193_v35  ;;  %v297_v47 = vand.u32 4294901760, %v296_v36  ;;  %v203_v50 = vand.u32 4294901760, %v3294_v39 }
   0xb   :  { %v184_v45 = vsub.f32 %v3260_v26, %v183_v34  ;;  %2722 = vmatpush3.msra.mxu0 %v3219_v10  ;;  %v304_v49 = vand.u32 4294901760, %v303_v38  ;;  %v213_v51 = vand.u32 4294901760, %v3297_v40  ;;  %v101_v56 = vsel %vm87_vm0, %v35_v42, 0 }
   0xc   :  { %2735 = vmatprep.subr.mxu1 %v290_v44  ;;  %v195_v55 = vand.u32 4294901760, %v194_v46  ;;  %2755 = vmatprep.subr.mxu0 %v3231_v15  ;;  %v104_v57 = vsel %vm87_vm0, %v36_v43, 0 }
   0xd   :  { %v185_v54 = vand.u32 4294901760, %v184_v45 }
   0xe   :  { %12 = vsyncpa [#allocation3], 0  ;;  %2736 = vmatpush3.msra.mxu1 %v290_v44  ;;  %v204_v58 = vsub.f32 %v3294_v39, %v203_v50  ;;  %v214_v59 = vsub.f32 %v3297_v40, %v213_v51  ;;  %v3335_v60 = vand.u32 4294901760, %v101_v56  ;;  %v3337_v61 = vand.u32 4294901760, %v104_v57  ;;  %69 = vperm.xlu1 %3122, %v43_v48  }
   0xf   :  { %2723 = vmatprep.mubr.f32.mxu0 %v185_v54  ;;  %2737 = vmatprep.subr.mxu1 %v297_v47  ;;  %v311_v62 = vand.u32 4294901760, %v310_v41  ;;  %v107_v63 = vsel %vm87_vm0, %v37_v52, 0  ;;  %v110_v0 = vsel %vm87_vm0, %v38_v53, 0  ;;  %vm962_vm1 = vcmask 523264  }
  0x10   :  { %2724 = vmatmul.mubr.f32.vlgmr.msra.gmra.mxu0 %v195_v55  ;;  %2738 = vmatpush3.msra.mxu1 %v297_v47  ;;  %v205_v1 = vand.u32 4294901760, %v204_v58  ;;  %v215_v2 = vand.u32 4294901760, %v214_v59  ;;  %v3342_v6 = vsub.f32 %v101_v56, %v3335_v60  ;;  %v3345_v7 = vsub.f32 %v104_v57, %v3337_v61 }
  0x11   :  { %2739 = vmatprep.subr.mxu1 %v304_v49  ;;  %2756 = vmatpush3.msra.mxu0 %v3231_v15  ;;  %v3348_v8 = vand.u32 4294901760, %v107_v63  ;;  %v3350_v9 = vand.u32 4294901760, %v110_v0 }
  0x12   :  { %2726 = vmatprep.mubr.f32.mxu0 %v205_v1  ;;  %2740 = vmatpush3.msra.mxu1 %v304_v49  ;;  %v223_v11 = vand.u32 4294901760, %v3342_v6  ;;  %v233_v12 = vand.u32 4294901760, %v3345_v7 }
  0x13   :  { %2741 = vmatprep.subr.mxu1 %v311_v62  ;;  %2757 = vmatprep.subr.mxu0 %v3238_v18  ;;  %v3356_v13 = vsub.f32 %v107_v63, %v3348_v8  ;;  %v3359_v14 = vsub.f32 %v110_v0, %v3350_v9 }
  0x14   :  { %2727 = vmatmul.mubr.f32.gmra.mxu0 %v215_v2  ;;  %2742 = vmatpush3.msra.mxu1 %v311_v62  ;;  %v224_v15 = vsub.f32 %v3342_v6, %v223_v11  ;;  %v234_v20 = vsub.f32 %v3345_v7, %v233_v12 }
  0x15   :  { %2744 = vmatmul.mubr.f32.vlgmr.msra.gmra.mxu1 %v3235_v17  ;;  %2775 = vmatprep.subr.mxu1 %v3204_v3  ;;  %v243_v21 = vand.u32 4294901760, %v3356_v13  ;;  %v253_v23 = vand.u32 4294901760, %v3359_v14 }
  0x16   :  { %v225_v24 = vand.u32 4294901760, %v224_v15  ;;  %2776 = vmatpush3.msra.mxu1 %v3204_v3  ;;  %v235_v33 = vand.u32 4294901760, %v234_v20  ;;  %2746 = vmatprep.mubr.f32.mxu1 %v3273_v30 }
  0x17   :  { %2758 = vmatpush3.msra.mxu0 %v3238_v18  ;;  %2777 = vmatprep.subr.mxu1 %v3206_v4  ;;  %v244_v36 = vsub.f32 %v3356_v13, %v243_v21  ;;  %v254_v37 = vsub.f32 %v3359_v14, %v253_v23  ;;  %v40_v18 = vld [vmem:[%s4033_s2 + $0x8] sm:$0xff] }
  0x18   :  { %2729 = vmatprep.mubr.f32.mxu0 %v225_v24  ;;  %2778 = vmatpush3.msra.mxu1 %v3206_v4 }
  0x19   :  { %2730 = vmatmul.mubr.f32.gmra.mxu0 %v235_v33  ;;  %2747 = vmatmul.mubr.f32.gmra.mxu1 %v3275_v31  ;;  %v245_v38 = vand.u32 4294901760, %v244_v36  ;;  %v255_v41 = vand.u32 4294901760, %v254_v37 }
  0x1a   :  { %2759 = vmatprep.subr.mxu0 %v3242_v19  ;;  %2749 = vmatprep.mubr.f32.mxu1 %v3335_v60 }
  0x1b   :  { %2732 = vmatprep.mubr.f32.mxu0 %v245_v38  ;;  %2760 = vmatpush3.msra.mxu0 %v3242_v19  ;;  %v921_v19 = vld [vmem:[%s4035_s4 + $0x38] sm:$0xff] }
  0x1c   :  { %2761 = vmatprep.subr.mxu0 %v3247_v22  ;;  %2779 = vmatprep.subr.mxu1 %v3208_v5 }
  0x1d   :  { %2733 = vmatmul.mubr.f32.gmra.mxu0 %v255_v41  ;;  %2750 = vmatmul.mubr.f32.gmra.mxu1 %v3337_v61 }
  0x1e   :  { %2762 = vmatpush3.msra.mxu0 %v3247_v22  ;;  %2763 = vmatprep.mubr.f32.mxu0 %v3260_v26  ;;  %v917_v22 = vld [vmem:[%s4035_s4 + $0x18] sm:$0xff]  ;;  %v915_v26 = vld [vmem:[%s4035_s4 + $0x8] sm:$0xff] }
  0x1f   :  { %2780 = vmatpush3.msra.mxu1 %v3208_v5  ;;  %2752 = vmatprep.mubr.f32.mxu1 %v3348_v8 }
  0x20   :  { %2781 = vmatprep.subr.mxu1 %v3219_v10  ;;  %2795 = vmatprep.subr.mxu0 %v3257_v25 }
  0x21   :  { %2764 = vmatmul.mubr.f32.vlgmr.msra.gmra.mxu0 %v3263_v27  ;;  %2753 = vmatmul.mubr.f32.gmra.mxu1 %v3350_v9  ;;  %v914_v27 = vld [vmem:[%s4035_s4] sm:$0xff] }
  0x22   :  { %2766 = vmatprep.mubr.f32.mxu0 %v3294_v39  ;;  %2782 = vmatpush3.msra.mxu1 %v3219_v10 }
  0x23   :  { %2783 = vmatprep.mubr.f32.mxu1 %v183_v34  ;;  %2796 = vmatpush3.msra.mxu0 %v3257_v25  ;;  %v916_v25 = vld [vmem:[%s4035_s4 + $0x10] sm:$0xff] }
  0x24   :  { %2815 = vmatprep.subr.mxu1 %v3204_v3  ;;  %2797 = vmatprep.subr.mxu0 %v3266_v28 }
  0x25   :  { %2767 = vmatmul.mubr.f32.gmra.mxu0 %v3297_v40  ;;  %2784 = vmatmul.mubr.f32.vlgmr.msra.gmra.mxu1 %v193_v35 }
  0x26   :  { %2769 = vmatprep.mubr.f32.mxu0 %v3342_v6  ;;  %2816 = vmatpush3.msra.mxu1 %v3204_v3  ;;  %v42_v3 = vld [vmem:[%s4033_s2 + $0x18] sm:$0xff] }
  0x27   :  { %2786 = vmatprep.mubr.f32.mxu1 %v203_v50  ;;  %2798 = vmatpush3.msra.mxu0 %v3266_v28  ;;  %v1835_v28 = vld [vmem:[%s4037_s6] sm:$0xff] }
  0x28   :  { %2817 = vmatprep.subr.mxu1 %v3206_v4  ;;  %2799 = vmatprep.subr.mxu0 %v3271_v29 }
  0x29   :  { %2770 = vmatmul.mubr.f32.gmra.mxu0 %v3345_v7  ;;  %2787 = vmatmul.mubr.f32.gmra.mxu1 %v213_v51 }
  0x2a   :  { %2772 = vmatprep.mubr.f32.mxu0 %v3356_v13  ;;  %2818 = vmatpush3.msra.mxu1 %v3206_v4  ;;  %v41_v4 = vld [vmem:[%s4033_s2 + $0x10] sm:$0xff] }
  0x2b   :  { %2789 = vmatprep.mubr.f32.mxu1 %v223_v11  ;;  %2800 = vmatpush3.msra.mxu0 %v3271_v29  ;;  %v1836_v29 = vld [vmem:[%s4037_s6 + $0x8] sm:$0xff] }
  0x2c   :  { %2801 = vmatprep.subr.mxu0 %v3278_v32  ;;  %2819 = vmatprep.subr.mxu1 %v3208_v5 }
  0x2d   :  { %2773 = vmatmul.mubr.f32.gmra.mxu0 %v3359_v14  ;;  %2790 = vmatmul.mubr.f32.gmra.mxu1 %v233_v12 }
  0x2e   :  { %2802 = vmatpush3.msra.mxu0 %v3278_v32  ;;  %2803 = vmatprep.mubr.f32.mxu0 %v3233_v16 }
  0x2f   :  { %2820 = vmatpush3.msra.mxu1 %v3208_v5  ;;  %2792 = vmatprep.mubr.f32.mxu1 %v243_v21  ;;  %v39_v5 = vld [vmem:[%s4033_s2] sm:$0xff] }
  0x30   :  { %2821 = vmatprep.subr.mxu1 %v3219_v10  ;;  %64 = vperm.xlu0 %3121, %v42_v3  }
  0x31   :  { %2804 = vmatmul.mubr.f32.vlgmr.msra.gmra.mxu0 %v3235_v17  ;;  %2793 = vmatmul.mubr.f32.gmra.mxu1 %v253_v23 }
  0x32   :  { %2806 = vmatprep.mubr.f32.mxu0 %v3273_v30  ;;  %2822 = vmatpush3.msra.mxu1 %v3219_v10  ;;  %v920_v10 = vld [vmem:[%s4035_s4 + $0x30] sm:$0xff] }
  0x33   :  { %2823 = vmatprep.mubr.f32.mxu1 %v3233_v16  ;;  %59 = vperm.xlu1 %3122, %v41_v4   ;;  %v919_v16 = vld [vmem:[%s4035_s4 + $0x28] sm:$0xff] }
  0x34   :  { %54 = vperm.xlu0 %3121, %v40_v18  }
  0x35   :  { %2807 = vmatmul.mubr.f32.gmra.mxu0 %v3275_v31  ;;  %2824 = vmatmul.mubr.f32.vlgmr.msra.gmra.mxu1 %v3235_v17  ;;  %v918_v17 = vld [vmem:[%s4035_s4 + $0x20] sm:$0xff] }
  0x36   :  { %2809 = vmatprep.mubr.f32.mxu0 %v3335_v60  ;;  %2826 = vmatprep.mubr.f32.mxu1 %v3273_v30  ;;  %v906_v30 = vld [vmem:[%s4034_s3] sm:$0xff] }
  0x37   :  { %49 = vperm.xlu1 %3122, %v39_v5  }
  0x38   :  { %959 = vperm.xlu0 %3121, %v921_v19  }
  0x39   :  { %2810 = vmatmul.mubr.f32.gmra.mxu0 %v3337_v61  ;;  %2827 = vmatmul.mubr.f32.gmra.mxu1 %v3275_v31  ;;  %v964_v31 = vsel %vm962_vm1, %v906_v30, 0 }
  0x3a   :  { %2812 = vmatprep.mubr.f32.mxu0 %v3348_v8  ;;  %2829 = vmatprep.mubr.f32.mxu1 %v3335_v60  ;;  %v3489_v32 = vand.u32 4294901760, %v964_v31 }
  0x3b   :  { %954 = vperm.xlu1 %3122, %v920_v10  }
  0x3c   :  { %949 = vperm.xlu0 %3121, %v919_v16   ;;  %v3492_v34 = vsub.f32 %v964_v31, %v3489_v32 }
  0x3d   :  { %2813 = vmatmul.mubr.f32.gmra.mxu0 %v3350_v9  ;;  %2830 = vmatmul.mubr.f32.gmra.mxu1 %v3337_v61 }
  0x3e   :  { %2832 = vmatprep.mubr.f32.mxu1 %v3348_v8  ;;  %v1062_v35 = vand.u32 4294901760, %v3492_v34 }
  0x3f   :  { %944 = vperm.xlu1 %3122, %v918_v17  }
  0x40   :  { %939 = vperm.xlu0 %3121, %v917_v22   ;;  %v1063_v39 = vsub.f32 %v3492_v34, %v1062_v35 }
  0x41   :  { %2833 = vmatmul.mubr.f32.gmra.mxu1 %v3350_v9 }
  0x42   :  { %2879 = vmatprep.mubr.f32.mxu1 %v3489_v32  ;;  %v1064_v40 = vand.u32 4294901760, %v1063_v39 }
  0x43   :  { %934 = vperm.xlu1 %3122, %v916_v25  }
  0x44   :  { %929 = vperm.xlu0 %3121, %v915_v26   ;;  %2851 = vmatprep.mubr.f32.mxu0 %v1064_v40 }
  0x47   :  { %924 = vperm.xlu1 %3122, %v914_v27  }
  0x48   :  { %1839 = vperm.xlu0 %3121, %v1835_v28  }
  0x4b   :  { %1844 = vperm.xlu1 %3122, %v1836_v29  }
  0x7f   :  { %v75_v63 = vpop.permute.xlu1 %74 }
  0x80   :  { %v85_v58 = vpop.permute.xlu0 %84 }
  0x84   :  { %v80_v2 = vpop.permute.xlu0 %79 }
  0x89   :  { %v70_v11 = vpop.permute.xlu1 %69 }
  0xab   :  { %v65_v14 = vpop.permute.xlu0 %64 }
  0xae   :  { %v60_v33 = vpop.permute.xlu1 %59 }
  0xaf   :  { %v55_v41 = vpop.permute.xlu0 %54 }
  0xb2   :  { %v50_v27 = vpop.permute.xlu1 %49 }
  0xd0   :  { %v2725_v42 = vpop.f32.mrf.mxu0 }
  0xd1   :  { %v198_v17 = vadd.f32 %v2725_v42, %v55_v41 }
  0xd2   :  { %v3499_v43 = vpop.f32.mrf.mxu0 }
  0xd4   :  { %v2728_v44 = vpop.f32.mrf.mxu0 }
  0xd5   :  { %v3501_v45 = vpop.f32.mrf.mxu1  ;;  %v218_v21 = vadd.f32 %v2728_v44, %v65_v14 }
  0xd6   :  { %v207_v46 = vpop.f32.mrf.mxu0  ;;  %v355_v42 = vadd.f32 %v3501_v45, %v198_v17 }
  0xd7   :  { %v3503_v47 = vpop.f32.mrf.mxu1  ;;  %v208_v5 = vadd.f32 %v207_v46, %v60_v33 }
  0xd9   :  { %v2731_v48 = vpop.f32.mrf.mxu0  ;;  %v2748_v49 = vpop.f32.mrf.mxu1 }
  0xda   :  { %v238_v36 = vadd.f32 %v2731_v48, %v75_v63  ;;  %v367_v3 = vadd.f32 %v2748_v49, %v218_v21 }
  0xdb   :  { %v227_v50 = vpop.f32.mrf.mxu0  ;;  %v360_v51 = vpop.f32.mrf.mxu1 }
  0xdc   :  { %v228_v19 = vadd.f32 %v227_v50, %v70_v11  ;;  %v361_v28 = vadd.f32 %v360_v51, %v208_v5  ;;  %v188_v50 = vadd.f32 %v3499_v43, %v50_v27 }
  0xdd   :  { %v2734_v52 = vpop.f32.mrf.mxu0  ;;  %v2751_v53 = vpop.f32.mrf.mxu1 }
  0xde   :  { %v258_v10 = vadd.f32 %v2734_v52, %v85_v58  ;;  %v379_v16 = vadd.f32 %v2751_v53, %v238_v36 }
  0xdf   :  { %v247_v54 = vpop.f32.mrf.mxu0  ;;  %v372_v55 = vpop.f32.mrf.mxu1 }
  0xe0   :  { %v373_v29 = vadd.f32 %v372_v55, %v228_v19  ;;  %v248_v31 = vadd.f32 %v247_v54, %v80_v2  ;;  %v907_v54 = vld [vmem:[%s4034_s3 + $0x8] sm:$0xff] }
  0xe1   :  { %v3505_v56 = vpop.f32.mrf.mxu0  ;;  %v2754_v57 = vpop.f32.mrf.mxu1  ;;  %v967_v36 = vsel %vm962_vm1, %v907_v54, 0 }
  0xe2   :  { %v391_v48 = vadd.f32 %v2754_v57, %v258_v10  ;;  %v349_v57 = vadd.f32 %v3503_v47, %v188_v50  ;;  %v3543_v27 = vand.u32 4294901760, %v967_v36 }
  0xe3   :  { %v3507_v59 = vpop.f32.mrf.mxu0  ;;  %v384_v60 = vpop.f32.mrf.mxu1 }
  0xe4   :  { %v385_v52 = vadd.f32 %v384_v60, %v248_v31  ;;  %v910_v31 = vld [vmem:[%s4034_s3 + $0x20] sm:$0xff] }
  0xe5   :  { %v2768_v61 = vpop.f32.mrf.mxu0  ;;  %v3509_v62 = vpop.f32.mrf.mxu1 }
  0xe6   :  { %v492_v22 = vadd.f32 %v2768_v61, %v367_v3 }
  0xe7   :  { %v484_v0 = vpop.f32.mrf.mxu0  ;;  %v3511_v1 = vpop.f32.mrf.mxu1 }
  0xe8   :  { %v485_v49 = vadd.f32 %v484_v0, %v361_v28  ;;  %v478_v0 = vadd.f32 %v3505_v56, %v355_v42 }
  0xe9   :  { %v2771_v6 = vpop.f32.mrf.mxu0  ;;  %v2788_v7 = vpop.f32.mrf.mxu1 }
  0xea   :  { %v506_v30 = vadd.f32 %v2771_v6, %v379_v16  ;;  %v621_v39 = vadd.f32 %v2788_v7, %v492_v22  ;;  %v909_v16 = vld [vmem:[%s4034_s3 + $0x18] sm:$0xff] }
  0xeb   :  { %v498_v8 = vpop.f32.mrf.mxu0  ;;  %v612_v9 = vpop.f32.mrf.mxu1 }
  0xec   :  { %v499_v63 = vadd.f32 %v498_v8, %v373_v29  ;;  %v613_v51 = vadd.f32 %v612_v9, %v485_v49  ;;  %v471_v9 = vadd.f32 %v3507_v59, %v349_v57  ;;  %v911_v49 = vld [vmem:[%s4034_s3 + $0x28] sm:$0xff] }
  0xed   :  { %v2774_v12 = vpop.f32.mrf.mxu0  ;;  %v2791_v13 = vpop.f32.mrf.mxu1 }
  0xee   :  { %v637_v46 = vadd.f32 %v2791_v13, %v506_v30  ;;  %v520_v11 = vadd.f32 %v2774_v12, %v391_v48  ;;  %v605_v12 = vadd.f32 %v3509_v62, %v478_v0  ;;  %v597_v3 = vadd.f32 %v3511_v1, %v471_v9 }
  0xef   :  { %v512_v15 = vpop.f32.mrf.mxu0  ;;  %v628_v20 = vpop.f32.mrf.mxu1 }
  0xf0   :  { %v629_v55 = vadd.f32 %v628_v20, %v499_v63  ;;  %v513_v2 = vadd.f32 %v512_v15, %v385_v52 }
  0xf1   :  { %v3513_v23 = vpop.f32.mrf.mxu0  ;;  %v2794_v24 = vpop.f32.mrf.mxu1 }
  0xf2   :  { %v653_v60 = vadd.f32 %v2794_v24, %v520_v11  ;;  %v908_v24 = vld [vmem:[%s4034_s3 + $0x10] sm:$0xff] }
  0xf3   :  { %v3515_v37 = vpop.f32.mrf.mxu0  ;;  %v644_v38 = vpop.f32.mrf.mxu1  ;;  %v970_v1 = vsel %vm962_vm1, %v908_v24, 0 }
  0xf4   :  { %v645_v20 = vadd.f32 %v644_v38, %v513_v2  ;;  %v736_v17 = vadd.f32 %v3515_v37, %v597_v3  ;;  %v973_v37 = vsel %vm962_vm1, %v909_v16, 0  ;;  %v3566_v50 = vand.u32 4294901760, %v970_v1 }
  0xf5   :  { %v2808_v4 = vpop.f32.mrf.mxu0  ;;  %v3517_v18 = vpop.f32.mrf.mxu1  ;;  %v3581_v11 = vand.u32 4294901760, %v973_v37 }
  0xf6   :  { %v754_v53 = vadd.f32 %v2808_v4, %v621_v39  ;;  %v742_v4 = vadd.f32 %v3513_v23, %v605_v12 }
  0xf7   :  { %v747_v25 = vpop.f32.mrf.mxu0  ;;  %v3519_v26 = vpop.f32.mrf.mxu1  ;;  %v3625_v12 = vsub.f32 %v973_v37, %v3581_v11 }
  0xf8   :  { %v748_v8 = vadd.f32 %v747_v25, %v613_v51  ;;  %v859_v22 = vadd.f32 %v3517_v18, %v742_v4  ;;  %v853_v39 = vadd.f32 %v3519_v26, %v736_v17  ;;  %v976_v26 = vsel %vm962_vm1, %v910_v31, 0 }
  0xf9   :  { %v2811_v40 = vpop.f32.mrf.mxu0  ;;  %v2828_v44 = vpop.f32.mrf.mxu1  ;;  %v979_v51 = vsel %vm962_vm1, %v911_v49, 0 }
  0xfa   :  { %v766_v6 = vadd.f32 %v2811_v40, %v637_v46  ;;  %v871_v43 = vadd.f32 %v2828_v44, %v754_v53  ;;  %v899_v63 = vmax.f32 %v859_v22, 0.0  ;;  %v3564_v46 = vsub.f32 %v967_v36, %v3543_v27 }
  0xfb   :  { %v759_v58 = vpop.f32.mrf.mxu0  ;;  %v864_v61 = vpop.f32.mrf.mxu1 }
  0xfc   :  { %v760_v13 = vadd.f32 %v759_v58, %v629_v55  ;;  %v865_v41 = vadd.f32 %v864_v61, %v748_v8  ;;  %v901_v59 = vmax.f32 %v871_v43, 0.0  ;;  %v898_v61 = vmax.f32 %v853_v39, 0.0 }
  0xfd   :  { %v2814_v7 = vpop.f32.mrf.mxu0  ;;  %v2831_v45 = vpop.f32.mrf.mxu1  ;;  %v3597_v0 = vand.u32 4294901760, %v899_v63  ;;  %v1072_v2 = vand.u32 4294901760, %v3564_v46  ;;  %v3602_v43 = vsub.f32 %v970_v1, %v3566_v50 }
  0xfe   :  { %v883_v14 = vadd.f32 %v2831_v45, %v766_v6  ;;  %v778_v47 = vadd.f32 %v2814_v7, %v653_v60  ;;  %v900_v23 = vmax.f32 %v865_v41, 0.0  ;;  %v3553_v40 = vand.u32 4294901760, %v901_v59  ;;  %v913_v41 = vld [vmem:[%s4034_s3 + $0x38] sm:$0xff] }
  0xff   :  { %v771_v21 = vpop.f32.mrf.mxu0  ;;  %v876_v33 = vpop.f32.mrf.mxu1  ;;  %v3604_v7 = vand.u32 4294901760, %v976_v26  ;;  %v3621_v9 = vand.u32 4294901760, %v898_v61  ;;  %v1082_v24 = vand.u32 4294901760, %v3602_v43  ;;  %v985_v16 = vsel %vm962_vm1, %v913_v41, 0 }
 0x100   :  { %v903_v56 = vmax.f32 %v883_v14, 0.0  ;;  %v877_v15 = vadd.f32 %v876_v33, %v760_v13  ;;  %v772_v62 = vadd.f32 %v771_v21, %v645_v20  ;;  %v3569_v42 = vand.u32 4294901760, %v900_v23  ;;  %v912_v14 = vld [vmem:[%s4034_s3 + $0x30] sm:$0xff] }
 0x101   :  { %v2834_v5 = vpop.f32.mrf.mxu1  ;;  %v3585_v55 = vsub.f32 %v901_v59, %v3553_v40  ;;  %v3627_v20 = vand.u32 4294901760, %v979_v51  ;;  %v982_v3 = vsel %vm962_vm1, %v912_v14, 0 }
 0x102   :  { %v3536_v38 = vand.u32 4294901760, %v903_v56  ;;  %v902_v19 = vmax.f32 %v877_v15, 0.0  ;;  %v895_v10 = vadd.f32 %v2834_v5, %v778_v47  ;;  %v3607_v45 = vsub.f32 %v900_v23, %v3569_v42 }
 0x103   :  { %v888_v25 = vpop.f32.mrf.mxu1  ;;  %v3635_v47 = vand.u32 4294901760, %v3585_v55  ;;  %v1073_v15 = vsub.f32 %v3564_v46, %v1072_v2  ;;  %v3670_v1 = vand.u32 4294901760, %v982_v3 }
 0x104   :  { %v3546_v28 = vand.u32 4294901760, %v902_v19  ;;  %v905_v29 = vmax.f32 %v895_v10, 0.0  ;;  %v889_v30 = vadd.f32 %v888_v25, %v772_v62  ;;  %v3556_v18 = vsub.f32 %v903_v56, %v3536_v38 }
 0x105   :  { %v3641_v56 = vsub.f32 %v899_v63, %v3597_v0  ;;  %v3653_v5 = vand.u32 4294901760, %v3607_v45  ;;  %v3656_v62 = vsub.f32 %v976_v26, %v3604_v7  ;;  %v1092_v10 = vand.u32 4294901760, %v3625_v12 }
 0x106   :  { %v3558_v44 = vand.u32 4294901760, %v905_v29  ;;  %v904_v48 = vmax.f32 %v889_v30, 0.0  ;;  %v3572_v52 = vsub.f32 %v902_v19, %v3546_v28  ;;  %v3595_v57 = vand.u32 4294901760, %v3556_v18 }
 0x107   :  { %v3659_v19 = vsub.f32 %v898_v61, %v3621_v9  ;;  %v1188_v22 = vsub.f32 %v3585_v55, %v3635_v47  ;;  %v3668_v25 = vsub.f32 %v979_v51, %v3627_v20  ;;  %v1074_v23 = vand.u32 4294901760, %v1073_v15 }
 0x108   :  { %v3575_v53 = vsub.f32 %v905_v29, %v3558_v44  ;;  %v3577_v58 = vand.u32 4294901760, %v904_v48  ;;  %2835 = vmatprep.subr.mxu0 %v3558_v44  ;;  %v3616_v13 = vand.u32 4294901760, %v3572_v52  ;;  %v1174_v36 = vsub.f32 %v3556_v18, %v3595_v57 }
 0x109   :  { %2836 = vmatpush3.msra.mxu0 %v3558_v44  ;;  %v1083_v29 = vsub.f32 %v3602_v43, %v1082_v24  ;;  %v3677_v30 = vand.u32 4294901760, %v3641_v56  ;;  %v1195_v39 = vsub.f32 %v3607_v45, %v3653_v5  ;;  %v1102_v37 = vand.u32 4294901760, %v3656_v62 }
 0x10a   :  { %v3588_v6 = vsub.f32 %v904_v48, %v3577_v58  ;;  %2837 = vmatprep.subr.mxu0 %v3577_v58  ;;  %v3592_v54 = vand.u32 4294901760, %v3575_v53  ;;  %v1181_v59 = vsub.f32 %v3572_v52, %v3616_v13  ;;  %v1175_v17 = vand.u32 4294901760, %v1174_v36 }
 0x10b   :  { %2838 = vmatpush3.msra.mxu0 %v3577_v58  ;;  %v3683_v48 = vand.u32 4294901760, %v985_v16  ;;  %v1093_v49 = vsub.f32 %v3625_v12, %v1092_v10  ;;  %v3690_v63 = vand.u32 4294901760, %v3659_v19  ;;  %v1189_v26 = vand.u32 4294901760, %v1188_v22 }
 0x10c   :  { %2839 = vmatprep.subr.mxu0 %v3536_v38  ;;  %v1160_v60 = vsub.f32 %v3575_v53, %v3592_v54  ;;  %v3613_v8 = vand.u32 4294901760, %v3588_v6  ;;  %v1182_v31 = vand.u32 4294901760, %v1181_v59  ;;  %v1112_v61 = vand.u32 4294901760, %v3668_v25 }
 0x10d   :  { %2840 = vmatpush3.msra.mxu0 %v3536_v38  ;;  %v3695_v51 = vsub.f32 %v982_v3, %v3670_v1  ;;  %v1202_v14 = vsub.f32 %v3641_v56, %v3677_v30  ;;  %v3704_v36 = vsub.f32 %v985_v16, %v3683_v48  ;;  %v1094_v41 = vand.u32 4294901760, %v1093_v49 }
 0x10e   :  { %2841 = vmatprep.subr.mxu0 %v3546_v28  ;;  %v1161_v21 = vand.u32 4294901760, %v1160_v60  ;;  %v1167_v33 = vsub.f32 %v3588_v6, %v3613_v8  ;;  %v1084_v60 = vand.u32 4294901760, %v1083_v29  ;;  %v1209_v15 = vsub.f32 %v3659_v19, %v3690_v63 }
 0x10f   :  { %2842 = vmatpush3.msra.mxu0 %v3546_v28  ;;  %v1113_v3 = vsub.f32 %v3668_v25, %v1112_v61  ;;  %v1203_v59 = vand.u32 4294901760, %v1202_v14 }
 0x110   :  { %2843 = vmatprep.subr.mxu0 %v3553_v40  ;;  %2863 = vmatprep.subr.mxu1 %v1161_v21  ;;  %v1168_v4 = vand.u32 4294901760, %v1167_v33  ;;  %v1103_v33 = vsub.f32 %v3656_v62, %v1102_v37 }
 0x111   :  { %2844 = vmatpush3.msra.mxu0 %v3553_v40  ;;  %2864 = vmatpush3.msra.mxu1 %v1161_v21  ;;  %v1196_v21 = vand.u32 4294901760, %v1195_v39  ;;  %v1114_v22 = vand.u32 4294901760, %v1113_v3 }
 0x112   :  { %2845 = vmatprep.subr.mxu0 %v3569_v42  ;;  %2865 = vmatprep.subr.mxu1 %v1168_v4  ;;  %v1104_v16 = vand.u32 4294901760, %v1103_v33 }
 0x113   :  { %2846 = vmatpush3.msra.mxu0 %v3569_v42  ;;  %2866 = vmatpush3.msra.mxu1 %v1168_v4  ;;  %v1122_v4 = vand.u32 4294901760, %v3695_v51 }
 0x114   :  { %2847 = vmatprep.subr.mxu0 %v3597_v0  ;;  %2867 = vmatprep.subr.mxu1 %v1175_v17 }
 0x115   :  { %2848 = vmatpush3.msra.mxu0 %v3597_v0  ;;  %2868 = vmatpush3.msra.mxu1 %v1175_v17  ;;  %v1132_v17 = vand.u32 4294901760, %v3704_v36 }
 0x116   :  { %2849 = vmatprep.subr.mxu0 %v3621_v9  ;;  %2869 = vmatprep.subr.mxu1 %v1182_v31 }
 0x117   :  { %2850 = vmatpush3.msra.mxu0 %v3621_v9  ;;  %2870 = vmatpush3.msra.mxu1 %v1182_v31 }
 0x118   :  { %2852 = vmatmul.mubr.f32.vlgmr.msra.gmra.mxu0 %v1074_v23  ;;  %2871 = vmatprep.subr.mxu1 %v1189_v26  ;;  %v1123_v23 = vsub.f32 %v3695_v51, %v1122_v4 }
 0x119   :  { %2891 = vmatprep.subr.mxu0 %v3575_v53  ;;  %2872 = vmatpush3.msra.mxu1 %v1189_v26 }
 0x11a   :  { %2892 = vmatpush3.msra.mxu0 %v3575_v53  ;;  %2873 = vmatprep.subr.mxu1 %v1196_v21  ;;  %v1210_v53 = vand.u32 4294901760, %v1209_v15  ;;  %v1124_v29 = vand.u32 4294901760, %v1123_v23 }
 0x11b   :  { %2893 = vmatprep.subr.mxu0 %v3588_v6  ;;  %2854 = vmatprep.mubr.f32.mxu0 %v1084_v60 }
 0x11c   :  { %2874 = vmatpush3.msra.mxu1 %v1196_v21  ;;  %2894 = vmatpush3.msra.mxu0 %v3588_v6  ;;  %v1133_v6 = vsub.f32 %v3704_v36, %v1132_v17 }
 0x11d   :  { %2855 = vmatmul.mubr.f32.gmra.mxu0 %v1094_v41  ;;  %2875 = vmatprep.subr.mxu1 %v1203_v59 }
 0x11e   :  { %2895 = vmatprep.subr.mxu0 %v3556_v18  ;;  %2876 = vmatpush3.msra.mxu1 %v1203_v59 }
 0x11f   :  { %2896 = vmatpush3.msra.mxu0 %v3556_v18  ;;  %2877 = vmatprep.subr.mxu1 %v1210_v53  ;;  %v1134_v18 = vand.u32 4294901760, %v1133_v6 }
 0x120   :  { %2897 = vmatprep.subr.mxu0 %v3572_v52  ;;  %2857 = vmatprep.mubr.f32.mxu0 %v1104_v16 }
 0x121   :  { %2878 = vmatpush3.msra.mxu1 %v1210_v53  ;;  %2898 = vmatpush3.msra.mxu0 %v3572_v52 }
 0x122   :  { %2858 = vmatmul.mubr.f32.gmra.mxu0 %v1114_v22  ;;  %2880 = vmatmul.mubr.f32.vlgmr.msra.gmra.mxu1 %v3543_v27 }
 0x123   :  { %2899 = vmatprep.subr.mxu0 %v3585_v55  ;;  %2919 = vmatprep.subr.mxu1 %v3558_v44 }
 0x124   :  { %2900 = vmatpush3.msra.mxu0 %v3585_v55  ;;  %2920 = vmatpush3.msra.mxu1 %v3558_v44 }
 0x125   :  { %2901 = vmatprep.subr.mxu0 %v3607_v45  ;;  %2921 = vmatprep.subr.mxu1 %v3577_v58 }
 0x126   :  { %2860 = vmatprep.mubr.f32.mxu0 %v1124_v29  ;;  %2882 = vmatprep.mubr.f32.mxu1 %v3566_v50 }
 0x127   :  { %2902 = vmatpush3.msra.mxu0 %v3607_v45  ;;  %2922 = vmatpush3.msra.mxu1 %v3577_v58 }
 0x128   :  { %2861 = vmatmul.mubr.f32.gmra.mxu0 %v1134_v18  ;;  %2883 = vmatmul.mubr.f32.gmra.mxu1 %v3581_v11 }
 0x129   :  { %2903 = vmatprep.subr.mxu0 %v3641_v56  ;;  %2923 = vmatprep.subr.mxu1 %v3536_v38 }
 0x12a   :  { %2904 = vmatpush3.msra.mxu0 %v3641_v56  ;;  %2924 = vmatpush3.msra.mxu1 %v3536_v38 }
 0x12b   :  { %2905 = vmatprep.subr.mxu0 %v3659_v19  ;;  %2925 = vmatprep.subr.mxu1 %v3546_v28 }
 0x12c   :  { %2885 = vmatprep.mubr.f32.mxu1 %v3604_v7  ;;  %2906 = vmatpush3.msra.mxu0 %v3659_v19  ;;  %v955_v19 = vpop.permute.xlu1 %954 }
 0x12d   :  { %2907 = vmatprep.mubr.f32.mxu0 %v3492_v34  ;;  %2926 = vmatpush3.msra.mxu1 %v3546_v28 }
 0x12e   :  { %2886 = vmatmul.mubr.f32.gmra.mxu1 %v3627_v20  ;;  %2908 = vmatmul.mubr.f32.vlgmr.msra.gmra.mxu0 %v3564_v46 }
 0x12f   :  { %2927 = vmatprep.subr.mxu1 %v3553_v40  ;;  %2947 = vmatprep.subr.mxu0 %v3592_v54 }
 0x130   :  { %2928 = vmatpush3.msra.mxu1 %v3553_v40  ;;  %2948 = vmatpush3.msra.mxu0 %v3592_v54  ;;  %v945_v39 = vpop.permute.xlu1 %944 }
 0x131   :  { %2929 = vmatprep.subr.mxu1 %v3569_v42  ;;  %2949 = vmatprep.subr.mxu0 %v3613_v8 }
 0x132   :  { %2888 = vmatprep.mubr.f32.mxu1 %v3670_v1  ;;  %2910 = vmatprep.mubr.f32.mxu0 %v3602_v43 }
 0x133   :  { %2930 = vmatpush3.msra.mxu1 %v3569_v42  ;;  %2950 = vmatpush3.msra.mxu0 %v3613_v8 }
 0x134   :  { %2889 = vmatmul.mubr.f32.gmra.mxu1 %v3683_v48  ;;  %2911 = vmatmul.mubr.f32.gmra.mxu0 %v3625_v12  ;;  %v935_v60 = vpop.permute.xlu1 %934 }
 0x135   :  { %2931 = vmatprep.subr.mxu1 %v3597_v0  ;;  %2951 = vmatprep.subr.mxu0 %v3595_v57 }
 0x136   :  { %2932 = vmatpush3.msra.mxu1 %v3597_v0  ;;  %2952 = vmatpush3.msra.mxu0 %v3595_v57 }
 0x137   :  { %2933 = vmatprep.subr.mxu1 %v3621_v9  ;;  %2953 = vmatprep.subr.mxu0 %v3616_v13 }
 0x138   :  { %2913 = vmatprep.mubr.f32.mxu0 %v3656_v62  ;;  %2934 = vmatpush3.msra.mxu1 %v3621_v9  ;;  %v960_v62 = vpop.permute.xlu0 %959  ;;  %v925_v29 = vpop.permute.xlu1 %924 }
 0x139   :  { %2935 = vmatprep.mubr.f32.mxu1 %v1062_v35  ;;  %2954 = vmatpush3.msra.mxu0 %v3616_v13 }
 0x13a   :  { %2914 = vmatmul.mubr.f32.gmra.mxu0 %v3668_v25  ;;  %2936 = vmatmul.mubr.f32.vlgmr.msra.gmra.mxu1 %v1072_v2 }
 0x13b   :  { %2955 = vmatprep.subr.mxu0 %v3635_v47  ;;  %2975 = vmatprep.subr.mxu1 %v3558_v44 }
 0x13c   :  { %2956 = vmatpush3.msra.mxu0 %v3635_v47  ;;  %2976 = vmatpush3.msra.mxu1 %v3558_v44  ;;  %v950_v31 = vpop.permute.xlu0 %949 }
 0x13d   :  { %2957 = vmatprep.subr.mxu0 %v3653_v5  ;;  %2977 = vmatprep.subr.mxu1 %v3577_v58 }
 0x13e   :  { %2916 = vmatprep.mubr.f32.mxu0 %v3695_v51  ;;  %2938 = vmatprep.mubr.f32.mxu1 %v1082_v24 }
 0x13f   :  { %2958 = vmatpush3.msra.mxu0 %v3653_v5  ;;  %2978 = vmatpush3.msra.mxu1 %v3577_v58 }
 0x140   :  { %2917 = vmatmul.mubr.f32.gmra.mxu0 %v3704_v36  ;;  %2939 = vmatmul.mubr.f32.gmra.mxu1 %v1092_v10  ;;  %v940_v26 = vpop.permute.xlu0 %939 }
 0x141   :  { %2959 = vmatprep.subr.mxu0 %v3677_v30  ;;  %2979 = vmatprep.subr.mxu1 %v3536_v38 }
 0x142   :  { %2960 = vmatpush3.msra.mxu0 %v3677_v30  ;;  %2980 = vmatpush3.msra.mxu1 %v3536_v38 }
 0x143   :  { %2961 = vmatprep.subr.mxu0 %v3690_v63  ;;  %2981 = vmatprep.subr.mxu1 %v3546_v28 }
 0x144   :  { %2941 = vmatprep.mubr.f32.mxu1 %v1102_v37  ;;  %2962 = vmatpush3.msra.mxu0 %v3690_v63  ;;  %v930_v3 = vpop.permute.xlu0 %929 }
 0x145   :  { %2963 = vmatprep.mubr.f32.mxu0 %v3489_v32  ;;  %2982 = vmatpush3.msra.mxu1 %v3546_v28 }
 0x146   :  { %2942 = vmatmul.mubr.f32.gmra.mxu1 %v1112_v61  ;;  %2964 = vmatmul.mubr.f32.vlgmr.msra.gmra.mxu0 %v3543_v27 }
 0x147   :  { %2983 = vmatprep.subr.mxu1 %v3553_v40  ;;  %2944 = vmatprep.mubr.f32.mxu1 %v1122_v4 }
 0x148   :  { %2984 = vmatpush3.msra.mxu1 %v3553_v40  ;;  %2966 = vmatprep.mubr.f32.mxu0 %v3566_v50 }
 0x149   :  { %2985 = vmatprep.subr.mxu1 %v3569_v42 }
 0x14a   :  { %2986 = vmatpush3.msra.mxu1 %v3569_v42  ;;  %2967 = vmatmul.mubr.f32.gmra.mxu0 %v3581_v11 }
 0x14b   :  { %2945 = vmatmul.mubr.f32.gmra.mxu1 %v1132_v17  ;;  %2987 = vmatprep.subr.mxu1 %v3597_v0 }
 0x14c   :  { %2988 = vmatpush3.msra.mxu1 %v3597_v0  ;;  %2969 = vmatprep.mubr.f32.mxu0 %v3604_v7 }
 0x14d   :  { %2989 = vmatprep.subr.mxu1 %v3621_v9  ;;  %2991 = vmatprep.mubr.f32.mxu1 %v3489_v32  ;;  %v1833_v32 = vld [vmem:[%s4036_s5] sm:$0xff] }
 0x14e   :  { %2990 = vmatpush3.msra.mxu1 %v3621_v9  ;;  %2970 = vmatmul.mubr.f32.gmra.mxu0 %v3627_v20  ;;  %v1848_v34 = vsel %vm962_vm1, %v1833_v32, 0 }
 0x14f   :  { %2992 = vmatmul.mubr.f32.vlgmr.msra.gmra.mxu1 %v3543_v27  ;;  %2972 = vmatprep.mubr.f32.mxu0 %v3670_v1  ;;  %v3834_v35 = vand.u32 4294901760, %v1848_v34 }
 0x150   :  { %2994 = vmatprep.mubr.f32.mxu1 %v3566_v50 }
 0x151   :  { %4042 = vst [vmem:[#allocation5_spill] sm:$0xff] %v3834_v35  ;;  %v3837_v38 = vsub.f32 %v1848_v34, %v3834_v35 }
 0x152   :  { %2973 = vmatmul.mubr.f32.gmra.mxu0 %v3683_v48 }
 0x153   :  { %2995 = vmatmul.mubr.f32.gmra.mxu1 %v3581_v11  ;;  %v4039_v27 = vand.u32 4294901760, %v3837_v38 }
 0x154   :  { %2997 = vmatprep.mubr.f32.mxu1 %v3604_v7 }
 0x155   :  { %v1929_v28 = vsub.f32 %v3837_v38, %v4039_v27 }
 0x157   :  { %2998 = vmatmul.mubr.f32.gmra.mxu1 %v3627_v20  ;;  %v1930_v40 = vand.u32 4294901760, %v1929_v28 }
 0x158   :  { %3000 = vmatprep.mubr.f32.mxu1 %v3670_v1 }
 0x159   :  { %3019 = vmatprep.mubr.f32.mxu0 %v1930_v40 }
 0x15b   :  { %3001 = vmatmul.mubr.f32.gmra.mxu1 %v3683_v48 }
 0x15c   :  { %3038 = vmatprep.mubr.f32.mxu1 %v3834_v35 }
 0x1d8   :  { %v2853_v44 = vpop.f32.mrf.mxu0 }
 0x1d9   :  { %v1077_v22 = vadd.f32 %v2853_v44, %v930_v3 }
 0x1da   :  { %v1066_v46 = vpop.f32.mrf.mxu0 }
 0x1db   :  { %v1067_v40 = vadd.f32 %v1066_v46, %v925_v29  ;;  %v1834_v46 = vld [vmem:[%s4036_s5 + $0x8] sm:$0xff]  ;;  %s3152_s5 = smov [#allocation2]  }
 0x1dc   :  { %s2475_s25 = sshll.u32 %s3152_s5, 4  ;;  %s2476_s25 = int_to_ptr.vmem [resolvable:$true] %s2475_s25 }
 0x1dd   :  { %v2856_v50 = vpop.f32.mrf.mxu0  ;;  %s3129_s26 = scalar_lea.vmem %s2476_s25, 256  ;;  %p3134_p1 = scmp.lt.s32.totalorder %s2476_s25, %s2476_s25 }
 0x1de   :  { %v1097_v33 = vadd.f32 %v2856_v50, %v940_v26  ;;  %p3130_p0 = scmp.ne.s32.totalorder %s2476_s25, %s3129_s26  ;;  %p3135_p2 = scmp.lt.s32.totalorder %s3129_s26, %s3129_s26 }
 0x1df   :  { %v1086_v42 = vpop.f32.mrf.mxu0 }
 0x1e0   :  { %v1087_v4 = vadd.f32 %v1086_v42, %v935_v60  ;;  %p3136_p3 = por %p3135_p2, %p3134_p1 }
 0x1e2   :  { %v2859_v52 = vpop.f32.mrf.mxu0  ;;  %v2881_v58 = vpop.f32.mrf.mxu1  ;;  %p3137_p4 = pnand %p3136_p3, %p3130_p0 }
 0x1e3   :  { %v1117_v36 = vadd.f32 %v2859_v52, %v950_v31  ;;  %v1254_v27 = vadd.f32 %v2881_v58, %v1077_v22 }
 0x1e4   :  { %v1106_v11 = vpop.f32.mrf.mxu0  ;;  %v3844_v55 = vpop.f32.mrf.mxu1 }
 0x1e5   :  { %v1107_v59 = vadd.f32 %v1106_v11, %v945_v39 }
 0x1e8   :  { %v2862_v54 = vpop.f32.mrf.mxu0  ;;  %v2884_v57 = vpop.f32.mrf.mxu1 }
 0x1e9   :  { %v1266_v16 = vadd.f32 %v2884_v57, %v1097_v33  ;;  %v1137_v23 = vadd.f32 %v2862_v54, %v960_v62 }
 0x1ea   :  { %v1126_v0 = vpop.f32.mrf.mxu0  ;;  %v1259_v2 = vpop.f32.mrf.mxu1 }
 0x1eb   :  { %v1260_v18 = vadd.f32 %v1259_v2, %v1087_v4  ;;  %v1127_v50 = vadd.f32 %v1126_v0, %v955_v19 }
 0x1ee   :  { %v2887_v43 = vpop.f32.mrf.mxu1  ;;  %v2909_v7 = vpop.f32.mrf.mxu0 }
 0x1ef   :  { %v1278_v17 = vadd.f32 %v2887_v43, %v1117_v36  ;;  %v1248_v43 = vadd.f32 %v3844_v55, %v1067_v40  ;;  %v1385_v44 = vadd.f32 %v2909_v7, %v1254_v27 }
 0x1f0   :  { %v1271_v45 = vpop.f32.mrf.mxu1  ;;  %v3846_v8 = vpop.f32.mrf.mxu0 }
 0x1f1   :  { %v1272_v32 = vadd.f32 %v1271_v45, %v1107_v59  ;;  %v1378_v58 = vadd.f32 %v3846_v8, %v1248_v43 }
 0x1f4   :  { %v2890_v13 = vpop.f32.mrf.mxu1  ;;  %v2912_v9 = vpop.f32.mrf.mxu0 }
 0x1f5   :  { %v1399_v34 = vadd.f32 %v2912_v9, %v1266_v16  ;;  %v1290_v52 = vadd.f32 %v2890_v13, %v1137_v23 }
 0x1f6   :  { %v1283_v12 = vpop.f32.mrf.mxu1  ;;  %v1391_v20 = vpop.f32.mrf.mxu0 }
 0x1f7   :  { %v1392_v26 = vadd.f32 %v1391_v20, %v1260_v18  ;;  %v1284_v54 = vadd.f32 %v1283_v12, %v1127_v50 }
 0x1fa   :  { %v2915_v47 = vpop.f32.mrf.mxu0  ;;  %v2937_v56 = vpop.f32.mrf.mxu1 }
 0x1fb   :  { %v1413_v28 = vadd.f32 %v2915_v47, %v1278_v17  ;;  %v1516_v0 = vadd.f32 %v2937_v56, %v1385_v44 }
 0x1fc   :  { %v1405_v24 = vpop.f32.mrf.mxu0  ;;  %v3848_v5 = vpop.f32.mrf.mxu1 }
 0x1fd   :  { %v1406_v35 = vadd.f32 %v1405_v24, %v1272_v32 }
 0x200   :  { %v2918_v10 = vpop.f32.mrf.mxu0  ;;  %v2940_v25 = vpop.f32.mrf.mxu1 }
 0x201   :  { %v1532_v42 = vadd.f32 %v2940_v25, %v1399_v34  ;;  %v1427_v62 = vadd.f32 %v2918_v10, %v1290_v52  ;;  %v1508_v10 = vadd.f32 %v3848_v5, %v1378_v58 }
 0x202   :  { %v1419_v1 = vpop.f32.mrf.mxu0  ;;  %v1523_v30 = vpop.f32.mrf.mxu1 }
 0x203   :  { %v1524_v2 = vadd.f32 %v1523_v30, %v1392_v26  ;;  %v1420_v13 = vadd.f32 %v1419_v1, %v1284_v54 }
 0x206   :  { %v2943_v37 = vpop.f32.mrf.mxu1  ;;  %v2965_v48 = vpop.f32.mrf.mxu0 }
 0x207   :  { %v1548_v11 = vadd.f32 %v2943_v37, %v1413_v28  ;;  %v1851_v37 = vsel %vm962_vm1, %v1834_v46, 0 }
 0x208   :  { %v1539_v49 = vpop.f32.mrf.mxu1  ;;  %v3850_v63 = vpop.f32.mrf.mxu0 }
 0x209   :  { %v1540_v45 = vadd.f32 %v1539_v49, %v1406_v35  ;;  %v1665_v35 = vadd.f32 %v2965_v48, %v1516_v0  ;;  %v1659_v56 = vadd.f32 %v3850_v63, %v1508_v10 }
 0x20a   :  { %v2968_v61 = vpop.f32.mrf.mxu0 }
 0x20b   :  { %v2946_v51 = vpop.f32.mrf.mxu1  ;;  %v1677_v9 = vadd.f32 %v2968_v61, %v1532_v42 }
 0x20c   :  { %v1670_v14 = vpop.f32.mrf.mxu0  ;;  %v1564_v20 = vadd.f32 %v2946_v51, %v1427_v62 }
 0x20d   :  { %v1555_v21 = vpop.f32.mrf.mxu1  ;;  %v1671_v19 = vadd.f32 %v1670_v14, %v1524_v2 }
 0x20e   :  { %v2971_v41 = vpop.f32.mrf.mxu0  ;;  %v1556_v25 = vadd.f32 %v1555_v21, %v1420_v13  ;;  %v3862_v21 = vand.u32 4294901760, %v1851_v37 }
 0x20f   :  { %v2993_v15 = vpop.f32.mrf.mxu1  ;;  %v1689_v47 = vadd.f32 %v2971_v41, %v1548_v11 }
 0x210   :  { %v1682_v53 = vpop.f32.mrf.mxu0  ;;  %v1786_v1 = vadd.f32 %v2993_v15, %v1665_v35 }
 0x211   :  { %v1779_v6 = vpop.f32.mrf.mxu1  ;;  %v1683_v55 = vadd.f32 %v1682_v53, %v1540_v45 }
 0x212   :  { %v2974_v57 = vpop.f32.mrf.mxu0  ;;  %v1780_v5 = vadd.f32 %v1779_v6, %v1659_v56  ;;  %v1826_v53 = vmax.f32 %v1786_v1, 0.0  ;;  %v3874_v6 = vsub.f32 %v1851_v37, %v3862_v21 }
 0x213   :  { %v2996_v31 = vpop.f32.mrf.mxu1  ;;  %v1701_v49 = vadd.f32 %v2974_v57, %v1564_v20 }
 0x214   :  { %v1798_v27 = vadd.f32 %v2996_v31, %v1677_v9  ;;  %v1694_v7 = vpop.f32.mrf.mxu0  ;;  %v1825_v29 = vmax.f32 %v1780_v5, 0.0  ;;  %v3885_v40 = vand.u32 4294901760, %v1826_v53  ;;  %v1938_v11 = vand.u32 4294901760, %v3874_v6 }
 0x215   :  { %v1791_v39 = vpop.f32.mrf.mxu1  ;;  %v1695_v51 = vadd.f32 %v1694_v7, %v1556_v25 }
 0x216   :  { %v1792_v61 = vadd.f32 %v1791_v39, %v1671_v19  ;;  %v1828_v33 = vmax.f32 %v1798_v27, 0.0  ;;  %v3898_v42 = vand.u32 4294901760, %v1825_v29  ;;  %v3913_v62 = vsub.f32 %v1826_v53, %v3885_v40 }
 0x217   :  { %v2999_v24 = vpop.f32.mrf.mxu1 }
 0x218   :  { %v1810_v12 = vadd.f32 %v2999_v24, %v1689_v47  ;;  %v1827_v4 = vmax.f32 %v1792_v61, 0.0  ;;  %v3866_v22 = vand.u32 4294901760, %v1828_v33  ;;  %v1939_v47 = vsub.f32 %v3874_v6, %v1938_v11 }
 0x219   :  { %v1803_v30 = vpop.f32.mrf.mxu1  ;;  %v3928_v46 = vsub.f32 %v1825_v29, %v3898_v42  ;;  %v3941_v19 = vand.u32 4294901760, %v3913_v62  ;;  %v4043_v61 = vand.u32 4294901760, %v3837_v38 }
 0x21a   :  { %v1830_v60 = vmax.f32 %v1810_v12, 0.0  ;;  %v1804_v8 = vadd.f32 %v1803_v30, %v1683_v55  ;;  %v3876_v18 = vand.u32 4294901760, %v1827_v4  ;;  %v3889_v50 = vsub.f32 %v1828_v33, %v3866_v22 }
 0x21b   :  { %v3002_v14 = vpop.f32.mrf.mxu1  ;;  %v1940_v27 = vand.u32 4294901760, %v1939_v47  ;;  %v3948_v12 = vand.u32 4294901760, %v3928_v46  ;;  %v2008_v35 = vsub.f32 %v3913_v62, %v3941_v19 }
 0x21c   :  { %v3860_v36 = vand.u32 4294901760, %v1830_v60  ;;  %v1829_v41 = vmax.f32 %v1804_v8, 0.0  ;;  %v1822_v3 = vadd.f32 %v3002_v14, %v1701_v49  ;;  %v3903_v57 = vsub.f32 %v1827_v4, %v3876_v18  ;;  %v1840_v14 = vpop.permute.xlu0 %1839 }
 0x21d   :  { %v1815_v48 = vpop.f32.mrf.mxu1  ;;  %v3921_v9 = vand.u32 4294901760, %v3889_v50  ;;  %v2015_v30 = vsub.f32 %v3928_v46, %v3948_v12  ;;  %v2009_v37 = vand.u32 4294901760, %v2008_v35 }
 0x21e   :  { %v3864_v59 = vand.u32 4294901760, %v1829_v41  ;;  %v1832_v16 = vmax.f32 %v1822_v3, 0.0  ;;  %v1816_v17 = vadd.f32 %v1815_v48, %v1695_v51  ;;  %v3869_v63 = vsub.f32 %v1830_v60, %v3860_v36 }
 0x21f   :  { %v3934_v13 = vand.u32 4294901760, %v3903_v57  ;;  %v1994_v24 = vsub.f32 %v3889_v50, %v3921_v9  ;;  %v2016_v49 = vand.u32 4294901760, %v2015_v30 }
 0x220   :  { %v3871_v15 = vand.u32 4294901760, %v1832_v16  ;;  %v1831_v23 = vmax.f32 %v1816_v17, 0.0  ;;  %v3879_v32 = vsub.f32 %v1829_v41, %v3864_v59  ;;  %v3896_v26 = vand.u32 4294901760, %v3869_v63 }
 0x221   :  { %v2001_v7 = vsub.f32 %v3903_v57, %v3934_v13  ;;  %v1995_v10 = vand.u32 4294901760, %v1994_v24 }
 0x222   :  { %v1964_v34 = vsub.f32 %v1832_v16, %v3871_v15  ;;  %v3882_v28 = vand.u32 4294901760, %v1831_v23  ;;  %3003 = vmatprep.subr.mxu0 %v3871_v15  ;;  %v3910_v54 = vand.u32 4294901760, %v3879_v32  ;;  %v1980_v45 = vsub.f32 %v3869_v63, %v3896_v26 }
 0x223   :  { %3004 = vmatpush3.msra.mxu0 %v3871_v15  ;;  %v2002_v25 = vand.u32 4294901760, %v2001_v7 }
 0x224   :  { %v1971_v52 = vsub.f32 %v1831_v23, %v3882_v28  ;;  %3005 = vmatprep.subr.mxu0 %v3882_v28  ;;  %v3893_v31 = vand.u32 4294901760, %v1964_v34  ;;  %v1987_v0 = vsub.f32 %v3879_v32, %v3910_v54  ;;  %v1981_v20 = vand.u32 4294901760, %v1980_v45 }
 0x225   :  { %3006 = vmatpush3.msra.mxu0 %v3882_v28 }
 0x226   :  { %3007 = vmatprep.subr.mxu0 %v3860_v36  ;;  %v1966_v43 = vsub.f32 %v1964_v34, %v3893_v31  ;;  %v3907_v44 = vand.u32 4294901760, %v1971_v52  ;;  %v1988_v55 = vand.u32 4294901760, %v1987_v0 }
 0x227   :  { %3008 = vmatpush3.msra.mxu0 %v3860_v36 }
 0x228   :  { %3009 = vmatprep.subr.mxu0 %v3864_v59  ;;  %v1967_v39 = vand.u32 4294901760, %v1966_v43  ;;  %v1973_v2 = vsub.f32 %v1971_v52, %v3907_v44 }
 0x229   :  { %3010 = vmatpush3.msra.mxu0 %v3864_v59 }
 0x22a   :  { %3011 = vmatprep.subr.mxu0 %v3866_v22  ;;  %3022 = vmatprep.subr.mxu1 %v1967_v39  ;;  %v1974_v58 = vand.u32 4294901760, %v1973_v2 }
 0x22b   :  { %3012 = vmatpush3.msra.mxu0 %v3866_v22  ;;  %3023 = vmatpush3.msra.mxu1 %v1967_v39 }
 0x22c   :  { %3013 = vmatprep.subr.mxu0 %v3876_v18  ;;  %3024 = vmatprep.subr.mxu1 %v1974_v58 }
 0x22d   :  { %3014 = vmatpush3.msra.mxu0 %v3876_v18  ;;  %3025 = vmatpush3.msra.mxu1 %v1974_v58 }
 0x22e   :  { %3015 = vmatprep.subr.mxu0 %v3885_v40  ;;  %3026 = vmatprep.subr.mxu1 %v1981_v20 }
 0x22f   :  { %3016 = vmatpush3.msra.mxu0 %v3885_v40  ;;  %3027 = vmatpush3.msra.mxu1 %v1981_v20 }
 0x230   :  { %3017 = vmatprep.subr.mxu0 %v3898_v42  ;;  %3028 = vmatprep.subr.mxu1 %v1988_v55 }
 0x231   :  { %3018 = vmatpush3.msra.mxu0 %v3898_v42  ;;  %3029 = vmatpush3.msra.mxu1 %v1988_v55 }
 0x232   :  { %3020 = vmatmul.mubr.f32.vlgmr.msra.gmra.mxu0 %v1940_v27  ;;  %3030 = vmatprep.subr.mxu1 %v1995_v10 }
 0x233   :  { %3041 = vmatprep.subr.mxu0 %v1964_v34  ;;  %3031 = vmatpush3.msra.mxu1 %v1995_v10 }
 0x234   :  { %3042 = vmatpush3.msra.mxu0 %v1964_v34  ;;  %3032 = vmatprep.subr.mxu1 %v2002_v25 }
 0x235   :  { %3043 = vmatprep.subr.mxu0 %v1971_v52  ;;  %3033 = vmatpush3.msra.mxu1 %v2002_v25 }
 0x236   :  { %3044 = vmatpush3.msra.mxu0 %v1971_v52  ;;  %3034 = vmatprep.subr.mxu1 %v2009_v37 }
 0x237   :  { %3045 = vmatprep.subr.mxu0 %v3869_v63  ;;  %3035 = vmatpush3.msra.mxu1 %v2009_v37 }
 0x238   :  { %3046 = vmatpush3.msra.mxu0 %v3869_v63  ;;  %3036 = vmatprep.subr.mxu1 %v2016_v49 }
 0x239   :  { %3047 = vmatprep.subr.mxu0 %v3879_v32  ;;  %3037 = vmatpush3.msra.mxu1 %v2016_v49 }
 0x23a   :  { %3048 = vmatpush3.msra.mxu0 %v3879_v32  ;;  %3039 = vmatmul.mubr.f32.vlgmr.msra.gmra.mxu1 %v3862_v21  ;;  %v1845_v32 = vpop.permute.xlu1 %1844 }
 0x23b   :  { %3049 = vmatprep.subr.mxu0 %v3889_v50  ;;  %3060 = vmatprep.subr.mxu1 %v3871_v15 }
 0x23c   :  { %3050 = vmatpush3.msra.mxu0 %v3889_v50  ;;  %3061 = vmatpush3.msra.mxu1 %v3871_v15 }
 0x23d   :  { %3051 = vmatprep.subr.mxu0 %v3903_v57  ;;  %3062 = vmatprep.subr.mxu1 %v3882_v28 }
 0x23e   :  { %3052 = vmatpush3.msra.mxu0 %v3903_v57  ;;  %3063 = vmatpush3.msra.mxu1 %v3882_v28 }
 0x23f   :  { %3053 = vmatprep.subr.mxu0 %v3913_v62  ;;  %3064 = vmatprep.subr.mxu1 %v3860_v36 }
 0x240   :  { %3054 = vmatpush3.msra.mxu0 %v3913_v62  ;;  %3065 = vmatpush3.msra.mxu1 %v3860_v36 }
 0x241   :  { %3055 = vmatprep.subr.mxu0 %v3928_v46  ;;  %3066 = vmatprep.subr.mxu1 %v3864_v59 }
 0x242   :  { %3056 = vmatpush3.msra.mxu0 %v3928_v46  ;;  %3057 = vmatprep.mubr.f32.mxu0 %v3837_v38  ;;  %v4044_v38 = vld [vmem:[#allocation5_spill] sm:$0xff] }
 0x243   :  { %3067 = vmatpush3.msra.mxu1 %v3864_v59  ;;  %3058 = vmatmul.mubr.f32.vlgmr.msra.gmra.mxu0 %v3874_v6 }
 0x244   :  { %3068 = vmatprep.subr.mxu1 %v3866_v22  ;;  %3079 = vmatprep.subr.mxu0 %v3893_v31 }
 0x245   :  { %3069 = vmatpush3.msra.mxu1 %v3866_v22  ;;  %3080 = vmatpush3.msra.mxu0 %v3893_v31 }
 0x246   :  { %3070 = vmatprep.subr.mxu1 %v3876_v18  ;;  %3081 = vmatprep.subr.mxu0 %v3907_v44 }
 0x247   :  { %3071 = vmatpush3.msra.mxu1 %v3876_v18  ;;  %3082 = vmatpush3.msra.mxu0 %v3907_v44 }
 0x248   :  { %3072 = vmatprep.subr.mxu1 %v3885_v40  ;;  %3083 = vmatprep.subr.mxu0 %v3896_v26 }
 0x249   :  { %3073 = vmatpush3.msra.mxu1 %v3885_v40  ;;  %3084 = vmatpush3.msra.mxu0 %v3896_v26 }
 0x24a   :  { %3074 = vmatprep.subr.mxu1 %v3898_v42  ;;  %3085 = vmatprep.subr.mxu0 %v3910_v54 }
 0x24b   :  { %3075 = vmatpush3.msra.mxu1 %v3898_v42  ;;  %3076 = vmatprep.mubr.f32.mxu1 %v4043_v61 }
 0x24c   :  { %3086 = vmatpush3.msra.mxu0 %v3910_v54  ;;  %3077 = vmatmul.mubr.f32.vlgmr.msra.gmra.mxu1 %v1938_v11 }
 0x24d   :  { %3087 = vmatprep.subr.mxu0 %v3921_v9  ;;  %3098 = vmatprep.subr.mxu1 %v3871_v15 }
 0x24e   :  { %3088 = vmatpush3.msra.mxu0 %v3921_v9  ;;  %3099 = vmatpush3.msra.mxu1 %v3871_v15 }
 0x24f   :  { %3089 = vmatprep.subr.mxu0 %v3934_v13  ;;  %3100 = vmatprep.subr.mxu1 %v3882_v28 }
 0x250   :  { %3090 = vmatpush3.msra.mxu0 %v3934_v13  ;;  %3101 = vmatpush3.msra.mxu1 %v3882_v28 }
 0x251   :  { %3091 = vmatprep.subr.mxu0 %v3941_v19  ;;  %3102 = vmatprep.subr.mxu1 %v3860_v36 }
 0x252   :  { %3092 = vmatpush3.msra.mxu0 %v3941_v19  ;;  %3103 = vmatpush3.msra.mxu1 %v3860_v36 }
 0x253   :  { %3093 = vmatprep.subr.mxu0 %v3948_v12  ;;  %3104 = vmatprep.subr.mxu1 %v3864_v59 }
 0x254   :  { %3094 = vmatpush3.msra.mxu0 %v3948_v12  ;;  %3095 = vmatprep.mubr.f32.mxu0 %v4044_v38 }
 0x255   :  { %3105 = vmatpush3.msra.mxu1 %v3864_v59  ;;  %3096 = vmatmul.mubr.f32.vlgmr.msra.gmra.mxu0 %v3862_v21 }
 0x256   :  { %3106 = vmatprep.subr.mxu1 %v3866_v22  ;;  %3114 = vmatprep.mubr.f32.mxu1 %v4044_v38 }
 0x257   :  { %3107 = vmatpush3.msra.mxu1 %v3866_v22 }
 0x258   :  { %3108 = vmatprep.subr.mxu1 %v3876_v18 }
 0x259   :  { %3109 = vmatpush3.msra.mxu1 %v3876_v18 }
 0x25a   :  { %3110 = vmatprep.subr.mxu1 %v3885_v40 }
 0x25b   :  { %3111 = vmatpush3.msra.mxu1 %v3885_v40 }
 0x25c   :  { %3112 = vmatprep.subr.mxu1 %v3898_v42 }
 0x25d   :  { %3113 = vmatpush3.msra.mxu1 %v3898_v42 }
 0x25e   :  { %3115 = vmatmul.mubr.f32.vlgmr.msra.gmra.mxu1 %v3862_v21 }
 0x2f2   :  { %v3021_v60 = vpop.f32.mrf.mxu0 }
 0x2f3   :  { %v1943_v34 = vadd.f32 %v3021_v60, %v1845_v32 }
 0x2f4   :  { %v1932_v8 = vpop.f32.mrf.mxu0 }
 0x2f5   :  { %v1933_v41 = vadd.f32 %v1932_v8, %v1840_v14 }
 0x2fa   :  { %v3040_v56 = vpop.f32.mrf.mxu1 }
 0x2fb   :  { %v2060_v40 = vadd.f32 %v3040_v56, %v1943_v34 }
 0x2fc   :  { %v2053_v51 = vpop.f32.mrf.mxu1 }
 0x2fd   :  { %v2054_v5 = vadd.f32 %v2053_v51, %v1933_v41 }
 0x303   :  { %v3059_v1 = vpop.f32.mrf.mxu0 }
 0x304   :  { %v2155_v52 = vadd.f32 %v3059_v1, %v2060_v40 }
 0x305   :  { %v2147_v33 = vpop.f32.mrf.mxu0 }
 0x306   :  { %v2148_v4 = vadd.f32 %v2147_v33, %v2054_v5 }
 0x30c   :  { %v3078_v36 = vpop.f32.mrf.mxu1 }
 0x30d   :  { %v2244_v31 = vadd.f32 %v3078_v36, %v2155_v52 }
 0x30e   :  { %v2235_v48 = vpop.f32.mrf.mxu1 }
 0x30f   :  { %v2236_v16 = vadd.f32 %v2235_v48, %v2148_v4 }
 0x315   :  { %v3097_v3 = vpop.f32.mrf.mxu0 }
 0x316   :  { %v2345_v26 = vadd.f32 %v3097_v3, %v2244_v31 }
 0x317   :  { %v2338_v59 = vpop.f32.mrf.mxu0 }
 0x318   :  { %v2339_v53 = vadd.f32 %v2338_v59, %v2236_v16 }
 0x31e   :  { %v3116_v17 = vpop.f32.mrf.mxu1 }
 0x31f   :  { %v2430_v42 = vadd.f32 %v3116_v17, %v2345_v26 }
 0x320   :  { %v2423_v22 = vpop.f32.mrf.mxu1 }
 0x321   :  { %v2424_v63 = vadd.f32 %v2423_v22, %v2339_v53  ;;  %v2433_v57 = vmax.f32 %v2430_v42, -3.0 }
 0x323   :  { %v2438_v21 = vmul.f32 -2.0, %v2424_v63  ;;  %3123 = vtanh.f32 %v2424_v63  ;;  %v2434_v62 = vmin.f32 %v2433_v57, 1.0  ;;  %v2437_v58 = vsub.f32 0.6931472, %v2424_v63 }
 0x325   :  { %v2440_v15 = vsub.f32 0.0, %v2438_v21  ;;  %v2439_v45 = vmax.f32 %v2438_v21, 0.0  ;;  %v2435_v46 = vsub.f32 0.0, %v2434_v62 }
 0x327   :  { %v2443_v23 = vand.u32 2147483647, %v2440_v15  ;;  %vm2441_vm3 = vcmp.ne.f32.partialorder %v2440_v15, %v2440_v15  ;;  %v2486_v20 = vadd.f32 -0.9189385, %v2435_v46 }
 0x329   :  { %v2444_v29 = vsub.f32 0.0, %v2443_v23 }
 0x32b   :  { %v2445_v6 = vmul.f32 1.442695, %v2444_v29 }
 0x32d   :  { %3125 = vpow2.f32 %v2445_v6 }
 0x330   :  { %v3124_v18 = vpop.eup %3123 }
 0x331   :  { %2468 = vst [vmem:[#allocation2] sm:$0xff] %v3124_v18 }
 0x33a   :  { %v3126_v28 = vpop.eup %3125 }
 0x33b   :  { %v2447_v50 = vadd.f32 1.0, %v3126_v28  ;;  %v2450_v11 = vmul.f32 -0.5, %v3126_v28  ;;  %v2453_v44 = vand.u32 2147483647, %v3126_v28 }
 0x33d   :  { %3127 = vlog2.f32 %v2447_v50  ;;  %v2451_v43 = vadd.f32 1.0, %v2450_v11  ;;  %vm2454_vm2 = vcmp.lt.f32.partialorder %v2453_v44, 0.0004427343 }
 0x33f   :  { %v2452_v2 = vmul.f32 %v3126_v28, %v2451_v43 }
 0x34a   :  { %v3128_v54 = vpop.eup %3127 }
 0x34b   :  { %v2449_v39 = vmul.f32 0.6931472, %v3128_v54 }
 0x34d   :  { %v2455_v9 = vsel %vm2454_vm2, %v2452_v2, %v2449_v39 }
 0x34e   :  { %v2456_v47 = vadd.f32 %v2455_v9, %v2439_v45 }
 0x350   :  { %v2457_v0 = vsel %vm2441_vm3, %v2438_v21, %v2456_v47 }
 0x351   :  { %v2458_v13 = vsub.f32 %v2437_v58, %v2457_v0 }
 0x353   :  { %v2459_v24 = vmul.f32 2.0, %v2458_v13 }
 0x355   :  { %v2460_v19 = vsub.f32 %v2486_v20, %v2459_v24 }
 0x357   :  { %v2461_v55 = vrot.slane %v2460_v19, 4 }
 0x359   :  { %v2462_v27 = vadd.f32 %v2461_v55, %v2460_v19 }
 0x35b   :  { %v2463_v7 = vrot.slane %v2462_v27, 2 }
 0x35d   :  { %v2464_v12 = vadd.f32 %v2463_v7, %v2462_v27 }
 0x35f   :  { %v2465_v10 = vrot.slane %v2464_v12, 1 }
 0x361   :  { %v2466_v35 = vadd.f32 %v2465_v10, %v2464_v12 }
 0x363   :  { %2469 = vst [vmem:[#allocation2 + $0x8] sm:$0x1] %v2466_v35 }
 0x364   :  { %3140 = shalt.err (!%p3137_p4)
}
 0x365   :  { %s3153_s27 = smov 128   ;;  %s3154_s28 = smov 8  }
 0x366   :  { %2481 = dma.vmem_to_hbm [thread:$0]  %s2476_s25, 256, %s4038_s7, [#allocation3], %s3153_s27, %s3153_s27, %s3154_s28  }
 0x367   :  { %3149 = dma.done.wait [#allocation3], 256  }
 0x368   :  { %3150 = vsyncadd [#allocation3], 4294967040 }
 0x369   :  { %2485 = vsyncpa [#allocation3], 1 }

</bundles_post_ra>
